<compile_context>
chip_gen: v7x
topology: tpu7x:2x2x1
jax: 0.10.0
libtpu: 0.0.40
codegen_flags: <defaults>
</compile_context>

<pallas_src>
import jax
import jax.numpy as jnp
from jax.experimental import pallas as pl
from jax.experimental.pallas import tpu as pltpu

# ----------------------------- problem sizes --------------------------------
B = 2            # batch
H = W = 16       # spatial (stand-in for 256/512 face crops)
CIN = 3          # RGB input
KPAD = 32        # 9*CIN = 27 zero-padded to 32 for aligned matmul K
COUT = 32        # encoder backbone channels (stand-in for IR-SE50 trunk)
D = 128          # latent / style dim (stand-in for StyleGAN2's 512)
N_STYLES = 16    # fixed by the module: Encoder.n_styles = 16 (split 3/4/9)
IMG_C = 3        # output image channels
IMG_FLAT = IMG_C * H * W
LEAK = 0.2       # LeakyReLU slope used throughout pSp / StyleGAN2


# ------------------------------ fused kernel ---------------------------------
def _network_fused_kernel(patches_ref, ident_ref,
                          conv_w_ref, w1_ref, b1_ref, w2_ref, b2_ref,
                          mw1a_ref, mw1b_ref, mb1_ref, mw2_ref, mb2_ref,
                          wsyn_ref, bsyn_ref,
                          img_ref,
                          codes_scratch):
    # ---- encoder backbone (TODO(synk): stand-in for the IR-SE50 trunk) ----
    # 3x3 conv as im2col matmul, ReLU, global average pool. bf16 operands,
    # f32 accumulation; `feat` never leaves vregs.
    patches = patches_ref[0]                                   # [HW, KPAD] bf16
    conv = jnp.dot(patches, conv_w_ref[...],
                   preferred_element_type=jnp.float32)         # [HW, COUT] f32
    conv = jnp.maximum(conv, 0.0)                              # ReLU
    feat = jnp.mean(conv, axis=0, keepdims=True)               # [1, COUT]

    # ---- style heads: feat -> hidden -> 16 style codes ----
    h = jnp.dot(feat.astype(jnp.bfloat16), w1_ref[...],
                preferred_element_type=jnp.float32) + b1_ref[...]
    h = jnp.where(h > 0, h, LEAK * h)                          # LeakyReLU
    codes_flat = jnp.dot(h.astype(jnp.bfloat16), w2_ref[...],
                         preferred_element_type=jnp.float32) + b2_ref[...]
    # Re-layout [1, 16*D] -> [16, D] through a VMEM scratch (16 lane-aligned
    # static sub-stores; avoids relying on in-kernel reshape lowering).
    for s in range(N_STYLES):
        codes_scratch[s:s + 1, :] = codes_flat[:, s * D:(s + 1) * D]
    codes = codes_scratch[...]                                 # [16, D] f32

    # ---- mapper residual (TODO(synk): stand-in for mapping_network(16)) ----
    # identity contribution computed ONCE and broadcast over the 16 styles.
    id_h = jnp.dot(ident_ref[0], mw1b_ref[...],
                   preferred_element_type=jnp.float32)         # [1, D]
    hm = (jnp.dot(codes.astype(jnp.bfloat16), mw1a_ref[...],
                  preferred_element_type=jnp.float32)
          + id_h + mb1_ref[...])                               # [16, D]
    hm = jnp.where(hm > 0, hm, LEAK * hm)
    delta = jnp.dot(hm.astype(jnp.bfloat16), mw2_ref[...],
                    preferred_element_type=jnp.float32) + mb2_ref[...]
    edit = codes + delta                                       # x_code_edit

    # ---- decoder synthesis (TODO(synk): stand-in for StyleGAN2 Generator) --
    w_mean = jnp.mean(edit, axis=0, keepdims=True)             # [1, D]
    img = jnp.dot(w_mean.astype(jnp.bfloat16), wsyn_ref[...],
                  preferred_element_type=jnp.float32) + bsyn_ref[...]
    img_ref[0] = jnp.tanh(img)                                 # [1, IMG_FLAT]


def _weight_spec(shape):
    # Whole-array block, identical every grid step (no re-DMA between steps).
    return pl.BlockSpec(shape, lambda b, _n=len(shape): (0,) * _n)


def network_fused(patches, ident3, p):
    """One fused pallas_call over grid=(B,); each step handles one batch row."""
    return pl.pallas_call(
        _network_fused_kernel,
        out_shape=jax.ShapeDtypeStruct((B, 1, IMG_FLAT), jnp.float32),
        grid=(B,),
        in_specs=[
            pl.BlockSpec((1, H * W, KPAD), lambda b: (b, 0, 0)),   # patches
            pl.BlockSpec((1, 1, D), lambda b: (b, 0, 0)),          # identity
            _weight_spec(p["conv_w"].shape),
            _weight_spec(p["w1"].shape),
            _weight_spec(p["b1"].shape),
            _weight_spec(p["w2"].shape),
            _weight_spec(p["b2"].shape),
            _weight_spec(p["mw1a"].shape),
            _weight_spec(p["mw1b"].shape),
            _weight_spec(p["mb1"].shape),
            _weight_spec(p["mw2"].shape),
            _weight_spec(p["mb2"].shape),
            _weight_spec(p["wsyn"].shape),
            _weight_spec(p["bsyn"].shape),
        ],
        out_specs=pl.BlockSpec((1, 1, IMG_FLAT), lambda b: (b, 0, 0)),
        scratch_shapes=[pltpu.VMEM((N_STYLES, D), jnp.float32)],
        compiler_params=pltpu.CompilerParams(
            dimension_semantics=("parallel",)),   # second TC on v7x
    )(patches, ident3,
      p["conv_w"], p["w1"], p["b1"], p["w2"], p["b2"],
      p["mw1a"], p["mw1b"], p["mb1"], p["mw2"], p["mb2"],
      p["wsyn"], p["bsyn"])


# ------------------------------ model pieces ---------------------------------
def _im2col_3x3(x_nchw):
    # TODO(synk): at real pSp sizes (256x256) this im2col should move inside a
    # tiled Pallas pipeline; at toy sizes the bf16-cast XLA version is cheap.
    x = jnp.transpose(x_nchw, (0, 2, 3, 1))                    # NHWC
    xp = jnp.pad(x, ((0, 0), (1, 1), (1, 1), (0, 0)))
    taps = [xp[:, ky:ky + H, kx:kx + W, :] for ky in range(3) for kx in range(3)]
    patches = jnp.concatenate(taps, axis=-1).reshape(B, H * W, 9 * CIN)
    patches = jnp.pad(patches, ((0, 0), (0, 0), (0, KPAD - 9 * CIN)))
    return patches.astype(jnp.bfloat16)                        # [B, HW, KPAD]


def init_params(key):
    ks = jax.random.split(key, 8)

    def n(k, shape, fan_in):
        w = jax.random.normal(k, shape, jnp.float32) / jnp.sqrt(jnp.float32(fan_in))
        return w.astype(jnp.bfloat16)                          # bf16 MXU operands

    conv_w = n(ks[0], (KPAD, COUT), 9 * CIN)
    conv_w = conv_w.at[9 * CIN:, :].set(0)                     # padded-K rows inert
    return {
        # encoder (stand-in for IR-SE50 trunk + GradualStyle heads)
        "conv_w": conv_w,
        "w1": n(ks[1], (COUT, D), COUT),
        "b1": jnp.zeros((1, D), jnp.float32),
        "w2": n(ks[2], (D, N_STYLES * D), D),
        "b2": jnp.zeros((1, N_STYLES * D), jnp.float32),
        # mapper (stand-in for mapping_network(16))
        "mw1a": n(ks[3], (D, D), D),
        "mw1b": n(ks[4], (D, D), D),
        "mb1": jnp.zeros((1, D), jnp.float32),
        "mw2": n(ks[5], (D, D), D),
        "mb2": jnp.zeros((1, D), jnp.float32),
        # decoder (stand-in for StyleGAN2 Generator synthesis + ToRGB)
        "wsyn": n(ks[6], (D, IMG_FLAT), D),
        "bsyn": jnp.zeros((1, IMG_FLAT), jnp.float32),
    }


def network_forward(x, y, identity, params):
    # The PyTorch module also encodes `y`, but those codes never reach the
    # output (`images` depends only on the x-side codes) — the dead pass is
    # eliminated here, keeping forward semantics identical.
    del y
    patches = _im2col_3x3(x)                                   # [B, HW, KPAD] bf16
    ident3 = identity.reshape(B, 1, D).astype(jnp.bfloat16)    # [B, 1, D]

    img_flat = network_fused(patches, ident3, params)          # [B, 1, IMG_FLAT]
    images = img_flat.reshape(B, IMG_C, H, W)                  # NCHW, like StyleGAN2
    result_latent = None                                       # return_latents=False
    return images, result_latent


# ---------------------------------- main --------------------------------------
if __name__ == "__main__":
    key = jax.random.PRNGKey(0)
    kx, ky_, kid, kp = jax.random.split(key, 4)
    x = jax.random.normal(kx, (B, CIN, H, W), jnp.float32)     # NCHW
    y = jax.random.normal(ky_, (B, CIN, H, W), jnp.float32)    # NCHW
    identity = jax.random.normal(kid, (B, D), jnp.float32)     # id embedding
    params = init_params(kp)

    images, result_latent = jax.jit(network_forward)(x, y, identity, params)
    jax.block_until_ready(images)
    assert images.shape == (B, IMG_C, H, W)
    assert result_latent is None
    print("KERNEL_OK")
</pallas_src>

<mosaic_0001>
module attributes {stable_mosaic.version = 11 : i64} {
  func.func @_network_fused_kernel(%arg0: i32, %arg1: memref<1x256x32xbf16, #tpu.memory_space<vmem>>, %arg2: memref<1x1x128xbf16, #tpu.memory_space<vmem>>, %arg3: memref<32x32xbf16, #tpu.memory_space<vmem>>, %arg4: memref<32x128xbf16, #tpu.memory_space<vmem>>, %arg5: memref<1x128xf32, #tpu.memory_space<vmem>>, %arg6: memref<128x2048xbf16, #tpu.memory_space<vmem>>, %arg7: memref<1x2048xf32, #tpu.memory_space<vmem>>, %arg8: memref<128x128xbf16, #tpu.memory_space<vmem>>, %arg9: memref<128x128xbf16, #tpu.memory_space<vmem>>, %arg10: memref<1x128xf32, #tpu.memory_space<vmem>>, %arg11: memref<128x128xbf16, #tpu.memory_space<vmem>>, %arg12: memref<1x128xf32, #tpu.memory_space<vmem>>, %arg13: memref<128x768xbf16, #tpu.memory_space<vmem>>, %arg14: memref<1x768xf32, #tpu.memory_space<vmem>>, %arg15: memref<1x1x768xf32, #tpu.memory_space<vmem>>, %arg16: memref<16x128xf32, #tpu.memory_space<vmem>>) attributes {dimension_semantics = [#tpu.dimension_semantics<parallel>], iteration_bounds = array<i64: 2>, scalar_prefetch = 0 : i64, scratch_operands = 1 : i64, tpu.core_type = #tpu.core_type<tc>, window_params = [{transform_indices = @transform_0, window_bounds = array<i64: 1, 256, 32>}, {transform_indices = @transform_1, window_bounds = array<i64: 1, 1, 128>}, {pipeline_mode = #tpu.pipeline_mode<synchronous>, transform_indices = @transform_2, window_bounds = array<i64: 32, 32>}, {pipeline_mode = #tpu.pipeline_mode<synchronous>, transform_indices = @transform_3, window_bounds = array<i64: 32, 128>}, {pipeline_mode = #tpu.pipeline_mode<synchronous>, transform_indices = @transform_4, window_bounds = array<i64: 1, 128>}, {pipeline_mode = #tpu.pipeline_mode<synchronous>, transform_indices = @transform_5, window_bounds = array<i64: 128, 2048>}, {pipeline_mode = #tpu.pipeline_mode<synchronous>, transform_indices = @transform_6, window_bounds = array<i64: 1, 2048>}, {pipeline_mode = #tpu.pipeline_mode<synchronous>, transform_indices = @transform_7, window_bounds = array<i64: 128, 128>}, {pipeline_mode = #tpu.pipeline_mode<synchronous>, transform_indices = @transform_8, window_bounds = array<i64: 128, 128>}, {pipeline_mode = #tpu.pipeline_mode<synchronous>, transform_indices = @transform_9, window_bounds = array<i64: 1, 128>}, {pipeline_mode = #tpu.pipeline_mode<synchronous>, transform_indices = @transform_10, window_bounds = array<i64: 128, 128>}, {pipeline_mode = #tpu.pipeline_mode<synchronous>, transform_indices = @transform_11, window_bounds = array<i64: 1, 128>}, {pipeline_mode = #tpu.pipeline_mode<synchronous>, transform_indices = @transform_12, window_bounds = array<i64: 128, 768>}, {pipeline_mode = #tpu.pipeline_mode<synchronous>, transform_indices = @transform_13, window_bounds = array<i64: 1, 768>}, {transform_indices = @transform_14, window_bounds = array<i64: 1, 1, 768>}]} {
    %c0 = arith.constant 0 : index
    %c0_0 = arith.constant 0 : index
    %c0_1 = arith.constant 0 : index
    %0 = vector.load %arg1[%c0, %c0_0, %c0_1] : memref<1x256x32xbf16, #tpu.memory_space<vmem>>, vector<1x256x32xbf16>
    %1 = vector.shape_cast %0 : vector<1x256x32xbf16> to vector<256x32xbf16>
    %c0_2 = arith.constant 0 : index
    %c0_3 = arith.constant 0 : index
    %2 = vector.load %arg3[%c0_2, %c0_3] : memref<32x32xbf16, #tpu.memory_space<vmem>>, vector<32x32xbf16>
    %cst = arith.constant dense<0.000000e+00> : vector<256x32xf32>
    %3 = tpu.matmul %1, %2, %cst {dimension_numbers = #tpu.dot_dimension_numbers<[1], [0], [0], [1], [0, 0, 1, 1], [], []>} : vector<256x32xbf16>, vector<32x32xbf16>, vector<256x32xf32> -> vector<256x32xf32>
    %cst_4 = arith.constant 0.000000e+00 : f32
    %4 = vector.broadcast %cst_4 : f32 to vector<256x32xf32>
    %5 = arith.maximumf %3, %4 : vector<256x32xf32>
    %cst_5 = arith.constant dense<0.000000e+00> : vector<32xf32>
    %6 = vector.multi_reduction <add>, %5, %cst_5 [0] : vector<256x32xf32> to vector<32xf32>
    %7 = vector.shape_cast %6 : vector<32xf32> to vector<1x32xf32>
    %cst_6 = arith.constant 2.560000e+02 : f32
    %8 = vector.broadcast %cst_6 : f32 to vector<1x32xf32>
    %9 = arith.divf %7, %8 : vector<1x32xf32>
    %10 = arith.truncf %9 : vector<1x32xf32> to vector<1x32xbf16>
    %c0_7 = arith.constant 0 : index
    %c0_8 = arith.constant 0 : index
    %11 = vector.load %arg4[%c0_7, %c0_8] : memref<32x128xbf16, #tpu.memory_space<vmem>>, vector<32x128xbf16>
    %cst_9 = arith.constant dense<0.000000e+00> : vector<1x128xf32>
    %12 = tpu.matmul %10, %11, %cst_9 {dimension_numbers = #tpu.dot_dimension_numbers<[1], [0], [0], [1], [0, 0, 1, 1], [], []>} : vector<1x32xbf16>, vector<32x128xbf16>, vector<1x128xf32> -> vector<1x128xf32>
    %c0_10 = arith.constant 0 : index
    %c0_11 = arith.constant 0 : index
    %13 = vector.load %arg5[%c0_10, %c0_11] : memref<1x128xf32, #tpu.memory_space<vmem>>, vector<1x128xf32>
    %14 = arith.addf %12, %13 : vector<1x128xf32>
    %cst_12 = arith.constant 0.000000e+00 : f32
    %15 = vector.broadcast %cst_12 : f32 to vector<1x128xf32>
    %16 = arith.cmpf ogt, %14, %15 : vector<1x128xf32>
    %cst_13 = arith.constant 2.000000e-01 : f32
    %17 = vector.broadcast %cst_13 : f32 to vector<1x128xf32>
    %18 = arith.mulf %17, %14 : vector<1x128xf32>
    %19 = arith.select %16, %14, %18 : vector<1x128xi1>, vector<1x128xf32>
    %20 = arith.truncf %19 : vector<1x128xf32> to vector<1x128xbf16>
    %c0_14 = arith.constant 0 : index
    %c0_15 = arith.constant 0 : index
    %21 = vector.load %arg6[%c0_14, %c0_15] : memref<128x2048xbf16, #tpu.memory_space<vmem>>, vector<128x2048xbf16>
    %cst_16 = arith.constant dense<0.000000e+00> : vector<1x2048xf32>
    %22 = tpu.matmul %20, %21, %cst_16 {dimension_numbers = #tpu.dot_dimension_numbers<[1], [0], [0], [1], [0, 0, 1, 1], [], []>} : vector<1x128xbf16>, vector<128x2048xbf16>, vector<1x2048xf32> -> vector<1x2048xf32>
    %c0_17 = arith.constant 0 : index
    %c0_18 = arith.constant 0 : index
    %23 = vector.load %arg7[%c0_17, %c0_18] : memref<1x2048xf32, #tpu.memory_space<vmem>>, vector<1x2048xf32>
    %24 = arith.addf %22, %23 : vector<1x2048xf32>
    %25 = vector.extract_strided_slice %24 {offsets = [0, 0], sizes = [1, 128], strides = [1, 1]} : vector<1x2048xf32> to vector<1x128xf32>
    %c0_19 = arith.constant 0 : index
    %c0_20 = arith.constant 0 : index
    %26 = vector.load %arg16[%c0_19, %c0_20] : memref<16x128xf32, #tpu.memory_space<vmem>>, vector<1x128xf32>
    tpu.vector_store %arg16[%c0_19, %c0_20], %25 {strides = array<i32>} : memref<16x128xf32, #tpu.memory_space<vmem>>, vector<1x128xf32>,
    %27 = vector.extract_strided_slice %24 {offsets = [0, 128], sizes = [1, 128], strides = [1, 1]} : vector<1x2048xf32> to vector<1x128xf32>
    %c1 = arith.constant 1 : index
    %c0_21 = arith.constant 0 : index
    %28 = vector.load %arg16[%c1, %c0_21] : memref<16x128xf32, #tpu.memory_space<vmem>>, vector<1x128xf32>
    tpu.vector_store %arg16[%c1, %c0_21], %27 {strides = array<i32>} : memref<16x128xf32, #tpu.memory_space<vmem>>, vector<1x128xf32>,
    %29 = vector.extract_strided_slice %24 {offsets = [0, 256], sizes = [1, 128], strides = [1, 1]} : vector<1x2048xf32> to vector<1x128xf32>
    %c2 = arith.constant 2 : index
    %c0_22 = arith.constant 0 : index
    %30 = vector.load %arg16[%c2, %c0_22] : memref<16x128xf32, #tpu.memory_space<vmem>>, vector<1x128xf32>
    tpu.vector_store %arg16[%c2, %c0_22], %29 {strides = array<i32>} : memref<16x128xf32, #tpu.memory_space<vmem>>, vector<1x128xf32>,
    %31 = vector.extract_strided_slice %24 {offsets = [0, 384], sizes = [1, 128], strides = [1, 1]} : vector<1x2048xf32> to vector<1x128xf32>
    %c3 = arith.constant 3 : index
    %c0_23 = arith.constant 0 : index
    %32 = vector.load %arg16[%c3, %c0_23] : memref<16x128xf32, #tpu.memory_space<vmem>>, vector<1x128xf32>
    tpu.vector_store %arg16[%c3, %c0_23], %31 {strides = array<i32>} : memref<16x128xf32, #tpu.memory_space<vmem>>, vector<1x128xf32>,
    %33 = vector.extract_strided_slice %24 {offsets = [0, 512], sizes = [1, 128], strides = [1, 1]} : vector<1x2048xf32> to vector<1x128xf32>
    %c4 = arith.constant 4 : index
    %c0_24 = arith.constant 0 : index
    %34 = vector.load %arg16[%c4, %c0_24] : memref<16x128xf32, #tpu.memory_space<vmem>>, vector<1x128xf32>
    tpu.vector_store %arg16[%c4, %c0_24], %33 {strides = array<i32>} : memref<16x128xf32, #tpu.memory_space<vmem>>, vector<1x128xf32>,
    %35 = vector.extract_strided_slice %24 {offsets = [0, 640], sizes = [1, 128], strides = [1, 1]} : vector<1x2048xf32> to vector<1x128xf32>
    %c5 = arith.constant 5 : index
    %c0_25 = arith.constant 0 : index
    %36 = vector.load %arg16[%c5, %c0_25] : memref<16x128xf32, #tpu.memory_space<vmem>>, vector<1x128xf32>
    tpu.vector_store %arg16[%c5, %c0_25], %35 {strides = array<i32>} : memref<16x128xf32, #tpu.memory_space<vmem>>, vector<1x128xf32>,
    %37 = vector.extract_strided_slice %24 {offsets = [0, 768], sizes = [1, 128], strides = [1, 1]} : vector<1x2048xf32> to vector<1x128xf32>
    %c6 = arith.constant 6 : index
    %c0_26 = arith.constant 0 : index
    %38 = vector.load %arg16[%c6, %c0_26] : memref<16x128xf32, #tpu.memory_space<vmem>>, vector<1x128xf32>
    tpu.vector_store %arg16[%c6, %c0_26], %37 {strides = array<i32>} : memref<16x128xf32, #tpu.memory_space<vmem>>, vector<1x128xf32>,
    %39 = vector.extract_strided_slice %24 {offsets = [0, 896], sizes = [1, 128], strides = [1, 1]} : vector<1x2048xf32> to vector<1x128xf32>
    %c7 = arith.constant 7 : index
    %c0_27 = arith.constant 0 : index
    %40 = vector.load %arg16[%c7, %c0_27] : memref<16x128xf32, #tpu.memory_space<vmem>>, vector<1x128xf32>
    tpu.vector_store %arg16[%c7, %c0_27], %39 {strides = array<i32>} : memref<16x128xf32, #tpu.memory_space<vmem>>, vector<1x128xf32>,
    %41 = vector.extract_strided_slice %24 {offsets = [0, 1024], sizes = [1, 128], strides = [1, 1]} : vector<1x2048xf32> to vector<1x128xf32>
    %c8 = arith.constant 8 : index
    %c0_28 = arith.constant 0 : index
    %42 = vector.load %arg16[%c8, %c0_28] : memref<16x128xf32, #tpu.memory_space<vmem>>, vector<1x128xf32>
    tpu.vector_store %arg16[%c8, %c0_28], %41 {strides = array<i32>} : memref<16x128xf32, #tpu.memory_space<vmem>>, vector<1x128xf32>,
    %43 = vector.extract_strided_slice %24 {offsets = [0, 1152], sizes = [1, 128], strides = [1, 1]} : vector<1x2048xf32> to vector<1x128xf32>
    %c9 = arith.constant 9 : index
    %c0_29 = arith.constant 0 : index
    %44 = vector.load %arg16[%c9, %c0_29] : memref<16x128xf32, #tpu.memory_space<vmem>>, vector<1x128xf32>
    tpu.vector_store %arg16[%c9, %c0_29], %43 {strides = array<i32>} : memref<16x128xf32, #tpu.memory_space<vmem>>, vector<1x128xf32>,
    %45 = vector.extract_strided_slice %24 {offsets = [0, 1280], sizes = [1, 128], strides = [1, 1]} : vector<1x2048xf32> to vector<1x128xf32>
    %c10 = arith.constant 10 : index
    %c0_30 = arith.constant 0 : index
    %46 = vector.load %arg16[%c10, %c0_30] : memref<16x128xf32, #tpu.memory_space<vmem>>, vector<1x128xf32>
    tpu.vector_store %arg16[%c10, %c0_30], %45 {strides = array<i32>} : memref<16x128xf32, #tpu.memory_space<vmem>>, vector<1x128xf32>,
    %47 = vector.extract_strided_slice %24 {offsets = [0, 1408], sizes = [1, 128], strides = [1, 1]} : vector<1x2048xf32> to vector<1x128xf32>
    %c11 = arith.constant 11 : index
    %c0_31 = arith.constant 0 : index
    %48 = vector.load %arg16[%c11, %c0_31] : memref<16x128xf32, #tpu.memory_space<vmem>>, vector<1x128xf32>
    tpu.vector_store %arg16[%c11, %c0_31], %47 {strides = array<i32>} : memref<16x128xf32, #tpu.memory_space<vmem>>, vector<1x128xf32>,
    %49 = vector.extract_strided_slice %24 {offsets = [0, 1536], sizes = [1, 128], strides = [1, 1]} : vector<1x2048xf32> to vector<1x128xf32>
    %c12 = arith.constant 12 : index
    %c0_32 = arith.constant 0 : index
    %50 = vector.load %arg16[%c12, %c0_32] : memref<16x128xf32, #tpu.memory_space<vmem>>, vector<1x128xf32>
    tpu.vector_store %arg16[%c12, %c0_32], %49 {strides = array<i32>} : memref<16x128xf32, #tpu.memory_space<vmem>>, vector<1x128xf32>,
    %51 = vector.extract_strided_slice %24 {offsets = [0, 1664], sizes = [1, 128], strides = [1, 1]} : vector<1x2048xf32> to vector<1x128xf32>
    %c13 = arith.constant 13 : index
    %c0_33 = arith.constant 0 : index
    %52 = vector.load %arg16[%c13, %c0_33] : memref<16x128xf32, #tpu.memory_space<vmem>>, vector<1x128xf32>
    tpu.vector_store %arg16[%c13, %c0_33], %51 {strides = array<i32>} : memref<16x128xf32, #tpu.memory_space<vmem>>, vector<1x128xf32>,
    %53 = vector.extract_strided_slice %24 {offsets = [0, 1792], sizes = [1, 128], strides = [1, 1]} : vector<1x2048xf32> to vector<1x128xf32>
    %c14 = arith.constant 14 : index
    %c0_34 = arith.constant 0 : index
    %54 = vector.load %arg16[%c14, %c0_34] : memref<16x128xf32, #tpu.memory_space<vmem>>, vector<1x128xf32>
    tpu.vector_store %arg16[%c14, %c0_34], %53 {strides = array<i32>} : memref<16x128xf32, #tpu.memory_space<vmem>>, vector<1x128xf32>,
    %55 = vector.extract_strided_slice %24 {offsets = [0, 1920], sizes = [1, 128], strides = [1, 1]} : vector<1x2048xf32> to vector<1x128xf32>
    %c15 = arith.constant 15 : index
    %c0_35 = arith.constant 0 : index
    %56 = vector.load %arg16[%c15, %c0_35] : memref<16x128xf32, #tpu.memory_space<vmem>>, vector<1x128xf32>
    tpu.vector_store %arg16[%c15, %c0_35], %55 {strides = array<i32>} : memref<16x128xf32, #tpu.memory_space<vmem>>, vector<1x128xf32>,
    %c0_36 = arith.constant 0 : index
    %c0_37 = arith.constant 0 : index
    %57 = vector.load %arg16[%c0_36, %c0_37] : memref<16x128xf32, #tpu.memory_space<vmem>>, vector<16x128xf32>
    %c0_38 = arith.constant 0 : index
    %c0_39 = arith.constant 0 : index
    %c0_40 = arith.constant 0 : index
    %58 = vector.load %arg2[%c0_38, %c0_39, %c0_40] : memref<1x1x128xbf16, #tpu.memory_space<vmem>>, vector<1x1x128xbf16>
    %59 = vector.shape_cast %58 : vector<1x1x128xbf16> to vector<1x128xbf16>
    %c0_41 = arith.constant 0 : index
    %c0_42 = arith.constant 0 : index
    %60 = vector.load %arg9[%c0_41, %c0_42] : memref<128x128xbf16, #tpu.memory_space<vmem>>, vector<128x128xbf16>
    %cst_43 = arith.constant dense<0.000000e+00> : vector<1x128xf32>
    %61 = tpu.matmul %59, %60, %cst_43 {dimension_numbers = #tpu.dot_dimension_numbers<[1], [0], [0], [1], [0, 0, 1, 1], [], []>} : vector<1x128xbf16>, vector<128x128xbf16>, vector<1x128xf32> -> vector<1x128xf32>
    %62 = arith.truncf %57 : vector<16x128xf32> to vector<16x128xbf16>
    %c0_44 = arith.constant 0 : index
    %c0_45 = arith.constant 0 : index
    %63 = vector.load %arg8[%c0_44, %c0_45] : memref<128x128xbf16, #tpu.memory_space<vmem>>, vector<128x128xbf16>
    %cst_46 = arith.constant dense<0.000000e+00> : vector<16x128xf32>
    %64 = tpu.matmul %62, %63, %cst_46 {dimension_numbers = #tpu.dot_dimension_numbers<[1], [0], [0], [1], [0, 0, 1, 1], [], []>} : vector<16x128xbf16>, vector<128x128xbf16>, vector<16x128xf32> -> vector<16x128xf32>
    %65 = vector.broadcast %61 : vector<1x128xf32> to vector<16x128xf32>
    %66 = arith.addf %64, %65 : vector<16x128xf32>
    %c0_47 = arith.constant 0 : index
    %c0_48 = arith.constant 0 : index
    %67 = vector.load %arg10[%c0_47, %c0_48] : memref<1x128xf32, #tpu.memory_space<vmem>>, vector<1x128xf32>
    %68 = vector.broadcast %67 : vector<1x128xf32> to vector<16x128xf32>
    %69 = arith.addf %66, %68 : vector<16x128xf32>
    %cst_49 = arith.constant 0.000000e+00 : f32
    %70 = vector.broadcast %cst_49 : f32 to vector<16x128xf32>
    %71 = arith.cmpf ogt, %69, %70 : vector<16x128xf32>
    %cst_50 = arith.constant 2.000000e-01 : f32
    %72 = vector.broadcast %cst_50 : f32 to vector<16x128xf32>
    %73 = arith.mulf %72, %69 : vector<16x128xf32>
    %74 = arith.select %71, %69, %73 : vector<16x128xi1>, vector<16x128xf32>
    %75 = arith.truncf %74 : vector<16x128xf32> to vector<16x128xbf16>
    %c0_51 = arith.constant 0 : index
    %c0_52 = arith.constant 0 : index
    %76 = vector.load %arg11[%c0_51, %c0_52] : memref<128x128xbf16, #tpu.memory_space<vmem>>, vector<128x128xbf16>
    %cst_53 = arith.constant dense<0.000000e+00> : vector<16x128xf32>
    %77 = tpu.matmul %75, %76, %cst_53 {dimension_numbers = #tpu.dot_dimension_numbers<[1], [0], [0], [1], [0, 0, 1, 1], [], []>} : vector<16x128xbf16>, vector<128x128xbf16>, vector<16x128xf32> -> vector<16x128xf32>
    %c0_54 = arith.constant 0 : index
    %c0_55 = arith.constant 0 : index
    %78 = vector.load %arg12[%c0_54, %c0_55] : memref<1x128xf32, #tpu.memory_space<vmem>>, vector<1x128xf32>
    %79 = vector.broadcast %78 : vector<1x128xf32> to vector<16x128xf32>
    %80 = arith.addf %77, %79 : vector<16x128xf32>
    %81 = arith.addf %57, %80 : vector<16x128xf32>
    %cst_56 = arith.constant dense<0.000000e+00> : vector<128xf32>
    %82 = vector.multi_reduction <add>, %81, %cst_56 [0] : vector<16x128xf32> to vector<128xf32>
    %83 = vector.shape_cast %82 : vector<128xf32> to vector<1x128xf32>
    %cst_57 = arith.constant 1.600000e+01 : f32
    %84 = vector.broadcast %cst_57 : f32 to vector<1x128xf32>
    %85 = arith.divf %83, %84 : vector<1x128xf32>
    %86 = arith.truncf %85 : vector<1x128xf32> to vector<1x128xbf16>
    %c0_58 = arith.constant 0 : index
    %c0_59 = arith.constant 0 : index
    %87 = vector.load %arg13[%c0_58, %c0_59] : memref<128x768xbf16, #tpu.memory_space<vmem>>, vector<128x768xbf16>
    %cst_60 = arith.constant dense<0.000000e+00> : vector<1x768xf32>
    %88 = tpu.matmul %86, %87, %cst_60 {dimension_numbers = #tpu.dot_dimension_numbers<[1], [0], [0], [1], [0, 0, 1, 1], [], []>} : vector<1x128xbf16>, vector<128x768xbf16>, vector<1x768xf32> -> vector<1x768xf32>
    %c0_61 = arith.constant 0 : index
    %c0_62 = arith.constant 0 : index
    %89 = vector.load %arg14[%c0_61, %c0_62] : memref<1x768xf32, #tpu.memory_space<vmem>>, vector<1x768xf32>
    %90 = arith.addf %88, %89 : vector<1x768xf32>
    %91 = math.tanh %90 : vector<1x768xf32>
    %c0_63 = arith.constant 0 : index
    %c0_64 = arith.constant 0 : index
    %c0_65 = arith.constant 0 : index
    %92 = vector.load %arg15[%c0_63, %c0_64, %c0_65] : memref<1x1x768xf32, #tpu.memory_space<vmem>>, vector<1x1x768xf32>
    %93 = vector.shape_cast %92 : vector<1x1x768xf32> to vector<1x768xf32>
    %94 = vector.shape_cast %91 : vector<1x768xf32> to vector<1x1x768xf32>
    tpu.vector_store %arg15[%c0_63, %c0_64, %c0_65], %94 {strides = array<i32>} : memref<1x1x768xf32, #tpu.memory_space<vmem>>, vector<1x1x768xf32>,
    return
  }
  func.func @transform_0(%arg0: i32) -> (i32, i32, i32) {
    %c0_i32 = arith.constant 0 : i32
    %c0_i32_0 = arith.constant 0 : i32
    %c0_i32_1 = arith.constant 0 : i32
    return %arg0, %c0_i32, %c0_i32_0 : i32, i32, i32
  }
  func.func @transform_1(%arg0: i32) -> (i32, i32, i32) {
    %c0_i32 = arith.constant 0 : i32
    %c0_i32_0 = arith.constant 0 : i32
    %c0_i32_1 = arith.constant 0 : i32
    return %arg0, %c0_i32, %c0_i32_0 : i32, i32, i32
  }
  func.func @transform_2(%arg0: i32) -> (i32, i32) {
    %c0_i32 = arith.constant 0 : i32
    %c0_i32_0 = arith.constant 0 : i32
    %c0_i32_1 = arith.constant 0 : i32
    return %c0_i32, %c0_i32_0 : i32, i32
  }
  func.func @transform_3(%arg0: i32) -> (i32, i32) {
    %c0_i32 = arith.constant 0 : i32
    %c0_i32_0 = arith.constant 0 : i32
    %c0_i32_1 = arith.constant 0 : i32
    return %c0_i32, %c0_i32_0 : i32, i32
  }
  func.func @transform_4(%arg0: i32) -> (i32, i32) {
    %c0_i32 = arith.constant 0 : i32
    %c0_i32_0 = arith.constant 0 : i32
    %c0_i32_1 = arith.constant 0 : i32
    return %c0_i32, %c0_i32_0 : i32, i32
  }
  func.func @transform_5(%arg0: i32) -> (i32, i32) {
    %c0_i32 = arith.constant 0 : i32
    %c0_i32_0 = arith.constant 0 : i32
    %c0_i32_1 = arith.constant 0 : i32
    return %c0_i32, %c0_i32_0 : i32, i32
  }
  func.func @transform_6(%arg0: i32) -> (i32, i32) {
    %c0_i32 = arith.constant 0 : i32
    %c0_i32_0 = arith.constant 0 : i32
    %c0_i32_1 = arith.constant 0 : i32
    return %c0_i32, %c0_i32_0 : i32, i32
  }
  func.func @transform_7(%arg0: i32) -> (i32, i32) {
    %c0_i32 = arith.constant 0 : i32
    %c0_i32_0 = arith.constant 0 : i32
    %c0_i32_1 = arith.constant 0 : i32
    return %c0_i32, %c0_i32_0 : i32, i32
  }
  func.func @transform_8(%arg0: i32) -> (i32, i32) {
    %c0_i32 = arith.constant 0 : i32
    %c0_i32_0 = arith.constant 0 : i32
    %c0_i32_1 = arith.constant 0 : i32
    return %c0_i32, %c0_i32_0 : i32, i32
  }
  func.func @transform_9(%arg0: i32) -> (i32, i32) {
    %c0_i32 = arith.constant 0 : i32
    %c0_i32_0 = arith.constant 0 : i32
    %c0_i32_1 = arith.constant 0 : i32
    return %c0_i32, %c0_i32_0 : i32, i32
  }
  func.func @transform_10(%arg0: i32) -> (i32, i32) {
    %c0_i32 = arith.constant 0 : i32
    %c0_i32_0 = arith.constant 0 : i32
    %c0_i32_1 = arith.constant 0 : i32
    return %c0_i32, %c0_i32_0 : i32, i32
  }
  func.func @transform_11(%arg0: i32) -> (i32, i32) {
    %c0_i32 = arith.constant 0 : i32
    %c0_i32_0 = arith.constant 0 : i32
    %c0_i32_1 = arith.constant 0 : i32
    return %c0_i32, %c0_i32_0 : i32, i32
  }
  func.func @transform_12(%arg0: i32) -> (i32, i32) {
    %c0_i32 = arith.constant 0 : i32
    %c0_i32_0 = arith.constant 0 : i32
    %c0_i32_1 = arith.constant 0 : i32
    return %c0_i32, %c0_i32_0 : i32, i32
  }
  func.func @transform_13(%arg0: i32) -> (i32, i32) {
    %c0_i32 = arith.constant 0 : i32
    %c0_i32_0 = arith.constant 0 : i32
    %c0_i32_1 = arith.constant 0 : i32
    return %c0_i32, %c0_i32_0 : i32, i32
  }
  func.func @transform_14(%arg0: i32) -> (i32, i32, i32) {
    %c0_i32 = arith.constant 0 : i32
    %c0_i32_0 = arith.constant 0 : i32
    %c0_i32_1 = arith.constant 0 : i32
    return %arg0, %c0_i32, %c0_i32_0 : i32, i32, i32
  }
}

</mosaic_0001>

<bundles_post_ra>
// kernel: network_forward.1
= control target key start
LH: loop header
LB: loop body
LE: loop exit
PB: predicated region body
PF: predicated region fallthrough
CT: control target
= control target key end

     0   :  { %s3736_s29 = smov 0   ;;  %s4600_s0 = inlined_call_operand.vmem [shape: bf16[2,256,32], index: 0, kind: input, shape index: {}]   ;;  %s4601_s1 = inlined_call_operand.vmem [shape: bf16[2,1,128], index: 1, kind: input, shape index: {}]   ;;  %s4602_s2 = inlined_call_operand.vmem [shape: bf16[32,32], index: 2, kind: input, shape index: {}]   ;;  %s4603_s3 = inlined_call_operand.vmem [shape: bf16[32,128], index: 3, kind: input, shape index: {}]   ;;  %s4604_s4 = inlined_call_operand.vmem [shape: f32[1,128], index: 4, kind: input, shape index: {}]   ;;  %s4605_s5 = inlined_call_operand.vmem [shape: bf16[128,2048], index: 5, kind: input, shape index: {}]   ;;  %s4606_s6 = inlined_call_operand.vmem [shape: f32[1,2048], index: 6, kind: input, shape index: {}]   ;;  %s4607_s7 = inlined_call_operand.vmem [shape: bf16[128,128], index: 7, kind: input, shape index: {}]   ;;  %s4608_s8 = inlined_call_operand.vmem [shape: bf16[128,128], index: 8, kind: input, shape index: {}]   ;;  %s4609_s9 = inlined_call_operand.vmem [shape: f32[1,128], index: 9, kind: input, shape index: {}]   ;;  %s4610_s10 = inlined_call_operand.vmem [shape: bf16[128,128], index: 10, kind: input, shape index: {}]   ;;  %s4611_s11 = inlined_call_operand.vmem [shape: f32[1,128], index: 11, kind: input, shape index: {}]   ;;  %s4612_s12 = inlined_call_operand.vmem [shape: bf16[128,768], index: 12, kind: input, shape index: {}]   ;;  %s4613_s13 = inlined_call_operand.vmem [shape: f32[1,768], index: 13, kind: input, shape index: {}]   ;;  %s4614_s14 = inlined_call_operand.vmem [shape: f32[2,1,768], index: 14, kind: output, shape index: {}]  }
   0x1 LB: > { %s3103_s30 = sadd.s32 4294967295, %s3655_s29   ;;  %p3107_p0 = scmp.ge.s32.totalorder %s3655_s29, 1  ;;  %s3655_s29 = sphi %s3736_s29, %s24_s29  }
   0x2   : > { %p420_p1 = scmp.lt.s32.totalorder %s3655_s29, 3 }
   0x4   : > { %p421_p2 = pnand %p3107_p0, %p420_p1 }
   0x5   : > { %v3521_v0 = vld [vmem:[%s4602_s2] sm:$0xff] (!%p421_p2)   ;;  %p468_p3 = scmp.lt.s32.totalorder (!%p421_p2), %s3103_s30, 1  ;;  %v3522_v1 = vld [vmem:[%s4602_s2 + $0x8] sm:$0xff] (!%p421_p2)   ;;  %vm609_vm0 = vcmask (!%p421_p2), 261120   ;;  %v3657_v19 = vmov (!%p421_p2), 0.0   ;;  %vm3658_vm1 = vmmov (!%p421_p2), 0  }
   0x6   : > { %424 = sbr.rel (%p421_p2) target bundleno = 1580 (0x62c), region = 76  ;;  %3400 = vmatprep.subr.bf16.mxu0 (!%p421_p2), %v3521_v0  ;;  %3504 = vmatprep.subr.bf16.mxu1 (!%p421_p2), %v3521_v0  ;;  %v3539_v18 = vld [vmem:[%s4603_s3] sm:$0xff] (!%p421_p2)   ;;  %v3540_v20 = vld [vmem:[%s4603_s3 + $0x8] sm:$0xff] (!%p421_p2)  }
   0x7   : > { %3401 = vmatpush3.bf16.msra.mxu0 (!%p421_p2), %v3521_v0  ;;  %3506 = vmatpush3.bf16.msra.mxu1 (!%p421_p2), %v3521_v0  ;;  %v988_v21 = vld [vmem:[%s4605_s5 + $0x8] sm:$0xff] (!%p421_p2)  ;;  %v3821_v30 = vld [vmem:[%s4605_s5] sm:$0xff] (!%p421_p2) }
   0x8   : > { %3402 = vmatprep.subr.bf16.mxu0 (!%p421_p2), %v3522_v1  ;;  %3505 = vmatprep.subr.bf16.mxu1 (!%p421_p2), %v3522_v1  ;;  %v996_v22 = vld [vmem:[%s4605_s5 + $0x48] sm:$0xff] (!%p421_p2)  ;;  %v3826_v31 = vld [vmem:[%s4605_s5 + $0x40] sm:$0xff] (!%p421_p2) }
   0x9   : > { %v1004_v23 = vld [vmem:[%s4605_s5 + $0x88] sm:$0xff] (!%p421_p2)  ;;  %v3149_v24 = vcombine.low (!%p421_p2), %v988_v21, %v996_v22  ;;  %v3150_v25 = vcombine.high (!%p421_p2), %v988_v21, %v996_v22  ;;  %v3147_v32 = vcombine.low (!%p421_p2), %v3821_v30, %v3826_v31  ;;  %v3148_v33 = vcombine.high (!%p421_p2), %v3821_v30, %v3826_v31  ;;  %v1051_v30 = vld [vmem:[%s4605_s5 + $0x200] sm:$0xff] (!%p421_p2) }
   0xa   : > { %v1012_v26 = vld [vmem:[%s4605_s5 + $0xc8] sm:$0xff] (!%p421_p2)  ;;  %v1059_v31 = vld [vmem:[%s4605_s5 + $0x240] sm:$0xff] (!%p421_p2) }
   0xb   : > { %3403 = vmatpush3.bf16.msra.mxu0 (!%p421_p2), %v3522_v1  ;;  %3507 = vmatpush3.bf16.msra.mxu1 (!%p421_p2), %v3522_v1  ;;  %v1020_v27 = vld [vmem:[%s4605_s5 + $0x108] sm:$0xff] (!%p421_p2)  ;;  %v3166_v28 = vcombine.high (!%p421_p2), %v1004_v23, %v1012_v26  ;;  %v3165_v34 = vcombine.low (!%p421_p2), %v1004_v23, %v1012_v26 }
   0xc   : > { %3436 = vmatprep.subr.bf16.mxu1 (!%p421_p2), %v3657_v19  ;;  %v1028_v29 = vld [vmem:[%s4605_s5 + $0x148] sm:$0xff] (!%p421_p2)  ;;  %1880 = vmatprep.subr.bf16.mxu0 (!%p421_p2), %v3150_v25 }
   0xd   : > { %s4616_s30 = smov (!%p468_p3, %s3103_s30), 1  ;;  %v3182_v35 = vcombine.high %v1020_v27, %v1028_v29  ;;  %v1036_v36 = vld [vmem:[%s4605_s5 + $0x188] sm:$0xff]  ;;  %v3181_v38 = vcombine.low %v1020_v27, %v1028_v29 }
   0xe   : > { %s3351_s19 = sshll.u32 %s4616_s30, 7  ;;  %v1044_v37 = vld [vmem:[%s4605_s5 + $0x1c8] sm:$0xff]  ;;  %s475_s23 = scalar_lea.vmem %s4601_s1, %s4616_s30 }
   0xf   : > { %s3756_s22 = scalar_lea.vmem %s4600_s0, %s3351_s19  ;;  %v3198_v39 = vcombine.high %v1036_v36, %v1044_v37  ;;  %v1052_v40 = vld [vmem:[%s4605_s5 + $0x208] sm:$0xff]  ;;  %v3197_v42 = vcombine.low %v1036_v36, %v1044_v37 }
  0x10   : > { %v3523_v2 = vld [vmem:[%s3756_s22] sm:$0xff]   ;;  %v3524_v3 = vld [vmem:[%s3756_s22 + $0x8] sm:$0xff]   ;;  %v3525_v4 = vld [vmem:[%s3756_s22 + $0x10] sm:$0xff]  }
  0x11   : > { %3404 = vmatprep.mubr.msk.bf16.mxu0 %vm609_vm0, %v3523_v2  ;;  %v3526_v5 = vld [vmem:[%s3756_s22 + $0x18] sm:$0xff]   ;;  %v3527_v6 = vld [vmem:[%s3756_s22 + $0x20] sm:$0xff]   ;;  %v3536_v8 = vld [vmem:[%s3756_s22 + $0x68] sm:$0xff]  }
  0x12   : > { %3405 = vmatmul.mubr.msk.bf16.vlgmr.msra.gmra.mrb[0].mxu0 %vm609_vm0, %v3524_v3  ;;  %v3535_v7 = vld [vmem:[%s3756_s22 + $0x60] sm:$0xff]   ;;  %v3528_v9 = vld [vmem:[%s3756_s22 + $0x28] sm:$0xff]   ;;  %v3537_v10 = vld [vmem:[%s3756_s22 + $0x70] sm:$0xff]  }
  0x13   : > { %3408 = vmatprep.mubr.msk.bf16.mxu0 %vm609_vm0, %v3525_v4  ;;  %3428 = vmatprep.mubr.msk.bf16.mxu1 %vm609_vm0, %v3535_v7  ;;  %v3529_v11 = vld [vmem:[%s3756_s22 + $0x30] sm:$0xff]   ;;  %v3538_v12 = vld [vmem:[%s3756_s22 + $0x78] sm:$0xff]   ;;  %v3531_v14 = vld [vmem:[%s3756_s22 + $0x40] sm:$0xff]  }
  0x14   : > { %3429 = vmatmul.mubr.msk.bf16.vlgmr.msra.gmra.mrb[0].mxu1 %vm609_vm0, %v3536_v8  ;;  %v3530_v13 = vld [vmem:[%s3756_s22 + $0x38] sm:$0xff]   ;;  %v3532_v15 = vld [vmem:[%s3756_s22 + $0x48] sm:$0xff]   ;;  %v3533_v16 = vld [vmem:[%s3756_s22 + $0x50] sm:$0xff]   ;;  %1881 = vmatpush1.bf16.msra.mxu0 %v3149_v24 }
  0x15   : > { %3432 = vmatprep.mubr.msk.bf16.mxu1 %vm609_vm0, %v3537_v10  ;;  %v3534_v17 = vld [vmem:[%s3756_s22 + $0x58] sm:$0xff]   ;;  %3437 = vmatpush3.bf16.msra.mxu1 %v3539_v18  ;;  %v1060_v41 = vld [vmem:[%s4605_s5 + $0x248] sm:$0xff]  ;;  %s3508_s22 = smul.u32 6, %s4616_s30 }
  0x16   : > { %3438 = vmatprep.subr.bf16.mxu1 %v3657_v19  ;;  %1882 = vmatprep.subr.bf16.mxu0 %v3166_v28  ;;  %v3214_v43 = vcombine.high %v1052_v40, %v1060_v41  ;;  %v1068_v44 = vld [vmem:[%s4605_s5 + $0x288] sm:$0xff]  ;;  %v3213_v46 = vcombine.low %v1052_v40, %v1060_v41 }
  0x17   : > { %v1076_v45 = vld [vmem:[%s4605_s5 + $0x2c8] sm:$0xff]  ;;  %s479_s25 = scalar_lea.vmem %s4614_s14, %s3508_s22 }
  0x18   : > { %1883 = vmatpush1.bf16.msra.mxu0 %v3165_v34  ;;  %v3230_v47 = vcombine.high %v1068_v44, %v1076_v45  ;;  %v1084_v48 = vld [vmem:[%s4605_s5 + $0x308] sm:$0xff]  ;;  %v3229_v50 = vcombine.low %v1068_v44, %v1076_v45 }
  0x19   : > { %3439 = vmatpush3.bf16.msra.mxu1 %v3540_v20  ;;  %1884 = vmatprep.subr.bf16.mxu0 %v3182_v35  ;;  %v1092_v49 = vld [vmem:[%s4605_s5 + $0x348] sm:$0xff] }
  0x1a   : > { %3409 = vmatmul.mubr.msk.bf16.gmra.mrb[4].mxu0 %vm609_vm0, %v3526_v5  ;;  %1839 = vmatprep.subr.bf16.mxu1 %v3148_v33  ;;  %v3246_v51 = vcombine.high %v1084_v48, %v1092_v49  ;;  %v3245_v52 = vcombine.low %v1084_v48, %v1092_v49 }
  0x1b   : > { %3412 = vmatprep.mubr.msk.bf16.mxu0 %vm609_vm0, %v3527_v6 }
  0x1c   : > { %3433 = vmatmul.mubr.msk.bf16.gmra.mrb[4].mxu1 %vm609_vm0, %v3538_v12  ;;  %1885 = vmatpush1.bf16.msra.mxu0 %v3181_v38 }
  0x1d   : > { %3440 = vmatprep.mubr.msk.bf16.mxu1 %vm3658_vm1, %v3657_v19  ;;  %1886 = vmatprep.subr.bf16.mxu0 %v3198_v39 }
  0x20   : > { %1887 = vmatpush1.bf16.msra.mxu0 %v3197_v42 }
  0x21   : > { %1888 = vmatprep.subr.bf16.mxu0 %v3214_v43 }
  0x22   : > { %3413 = vmatmul.mubr.msk.bf16.gmra.mrb[8].mxu0 %vm609_vm0, %v3528_v9 }
  0x23   : > { %3416 = vmatprep.mubr.msk.bf16.mxu0 %vm609_vm0, %v3529_v11 }
  0x24   : > { %1889 = vmatpush1.bf16.msra.mxu0 %v3213_v46 }
  0x25   : > { %1890 = vmatprep.subr.bf16.mxu0 %v3230_v47 }
  0x28   : > { %1891 = vmatpush1.bf16.msra.mxu0 %v3229_v50 }
  0x29   : > { %1892 = vmatprep.subr.bf16.mxu0 %v3246_v51 }
  0x2a   : > { %3417 = vmatmul.mubr.msk.bf16.gmra.mrb[12].mxu0 %vm609_vm0, %v3530_v13 }
  0x2b   : > { %3420 = vmatprep.mubr.msk.bf16.mxu0 %vm609_vm0, %v3531_v14 }
  0x2c   : > { %1893 = vmatpush1.bf16.msra.mxu0 %v3245_v52 }
  0x32   : > { %3421 = vmatmul.mubr.msk.bf16.gmra.mrb[16].mxu0 %vm609_vm0, %v3532_v15 }
  0x33   : > { %3424 = vmatprep.mubr.msk.bf16.mxu0 %vm609_vm0, %v3533_v16 }
  0x3a   : > { %3425 = vmatmul.mubr.msk.bf16.gmra.mrb[20].mxu0 %vm609_vm0, %v3534_v17 }
  0xe5   : > { %v3406_v53 = vpop.f32.mrb[0].mxu0 }
  0xe6   : > { %v692_v54 = vpop.f32.mrb[1].mxu0  ;;  %v821_v58 = vmax.f32 %v3406_v53, 0.0 }
  0xe7   : > { %v819_v55 = vmax.f32 %v692_v54, 0.0  ;;  %v3407_v56 = vpop.f32.mrb[2].mxu0  ;;  %v3860_v9 = vpop.f32.mrb[0].mxu1 }
  0xe8   : > { %v695_v57 = vpop.f32.mrb[3].mxu0  ;;  %v822_v61 = vmax.f32 %v3407_v56, 0.0  ;;  %v854_v0 = vsel %vm609_vm0, %v821_v58, 0.0  ;;  %v3863_v13 = vpop.f32.mrb[1].mxu1 }
  0xe9   : > { %v820_v59 = vmax.f32 %v695_v57, 0.0  ;;  %v851_v60 = vsel %vm609_vm0, %v819_v55, 0.0  ;;  %v3865_v15 = vpop.f32.mrb[2].mxu1 }
  0xea   : > { %v856_v4 = vsel %vm609_vm0, %v822_v61, 0.0  ;;  %v3868_v18 = vpop.f32.mrb[3].mxu1 }
  0xeb   : > { %v852_v62 = vsel %vm609_vm0, %v820_v59, 0.0 }
  0xec   : > { %v853_v63 = vadd.f32 %v852_v62, %v851_v60 }
  0xed   : > { %v3410_v1 = vpop.f32.mrb[4].mxu0 }
  0xee   : > { %v855_v2 = vadd.f32 %v854_v0, %v853_v63  ;;  %v708_v3 = vpop.f32.mrb[5].mxu0  ;;  %v825_v10 = vmax.f32 %v3410_v1, 0.0 }
  0xef   : > { %v823_v5 = vmax.f32 %v708_v3, 0.0  ;;  %v3411_v6 = vpop.f32.mrb[6].mxu0  ;;  %v3872_v33 = vpop.f32.mrb[4].mxu1 }
  0xf0   : > { %v857_v7 = vadd.f32 %v856_v4, %v855_v2  ;;  %v711_v8 = vpop.f32.mrb[7].mxu0  ;;  %v826_v16 = vmax.f32 %v3411_v6, 0.0  ;;  %v862_v21 = vsel %vm609_vm0, %v825_v10, 0.0  ;;  %v3875_v37 = vpop.f32.mrb[5].mxu1 }
  0xf1   : > { %v858_v11 = vsel %vm609_vm0, %v823_v5, 0.0  ;;  %v824_v12 = vmax.f32 %v711_v8, 0.0  ;;  %v3877_v39 = vpop.f32.mrb[6].mxu1 }
  0xf2   : > { %v859_v14 = vadd.f32 %v858_v11, %v857_v7  ;;  %v864_v25 = vsel %vm609_vm0, %v826_v16, 0.0  ;;  %v3880_v42 = vpop.f32.mrb[7].mxu1 }
  0xf3   : > { %v860_v17 = vsel %vm609_vm0, %v824_v12, 0.0 }
  0xf4   : > { %v861_v20 = vadd.f32 %v860_v17, %v859_v14 }
  0xf5   : > { %v3414_v22 = vpop.f32.mrb[8].mxu0 }
  0xf6   : > { %v863_v23 = vadd.f32 %v862_v21, %v861_v20  ;;  %v724_v24 = vpop.f32.mrb[9].mxu0  ;;  %v829_v34 = vmax.f32 %v3414_v22, 0.0 }
  0xf7   : > { %v827_v26 = vmax.f32 %v724_v24, 0.0  ;;  %v3415_v27 = vpop.f32.mrb[10].mxu0 }
  0xf8   : > { %v865_v28 = vadd.f32 %v864_v25, %v863_v23  ;;  %v727_v29 = vpop.f32.mrb[11].mxu0  ;;  %v830_v40 = vmax.f32 %v3415_v27, 0.0  ;;  %v870_v44 = vsel %vm609_vm0, %v829_v34, 0.0 }
  0xf9   : > { %v866_v35 = vsel %vm609_vm0, %v827_v26, 0.0  ;;  %v828_v36 = vmax.f32 %v727_v29, 0.0 }
  0xfa   : > { %v867_v38 = vadd.f32 %v866_v35, %v865_v28  ;;  %v872_v48 = vsel %vm609_vm0, %v830_v40, 0.0 }
  0xfb   : > { %v868_v41 = vsel %vm609_vm0, %v828_v36, 0.0  ;;  %v843_v36 = vmax.f32 %v3863_v13, 0.0  ;;  %v847_v13 = vmax.f32 %v3875_v37, 0.0 }
  0xfc   : > { %v869_v43 = vadd.f32 %v868_v41, %v867_v38 }
  0xfd   : > { %v3418_v45 = vpop.f32.mrb[12].mxu0 }
  0xfe   : > { %v871_v46 = vadd.f32 %v870_v44, %v869_v43  ;;  %v740_v47 = vpop.f32.mrb[13].mxu0  ;;  %v833_v53 = vmax.f32 %v3418_v45, 0.0  ;;  %v898_v44 = vsel %vm609_vm0, %v843_v36, 0.0  ;;  %v844_v45 = vmax.f32 %v3868_v18, 0.0  ;;  %v1099_v36 = vld [vmem:[%s4605_s5 + $0x380] sm:$0xff] }
  0xff   : > { %v831_v49 = vmax.f32 %v740_v47, 0.0  ;;  %v3419_v50 = vpop.f32.mrb[14].mxu0  ;;  %v845_v47 = vmax.f32 %v3860_v9, 0.0  ;;  %v848_v18 = vmax.f32 %v3880_v42, 0.0  ;;  %v849_v9 = vmax.f32 %v3872_v33, 0.0  ;;  %v1003_v33 = vld [vmem:[%s4605_s5 + $0x80] sm:$0xff] }
 0x100   : > { %v873_v51 = vadd.f32 %v872_v48, %v871_v46  ;;  %v743_v52 = vpop.f32.mrb[15].mxu0  ;;  %v834_v57 = vmax.f32 %v3419_v50, 0.0  ;;  %v878_v60 = vsel %vm609_vm0, %v833_v53, 0.0  ;;  %v900_v50 = vsel %vm609_vm0, %v844_v45, 0.0  ;;  %v989_v45 = vld [vmem:[%s4605_s5 + $0x10] sm:$0xff] }
 0x101   : > { %v874_v54 = vsel %vm609_vm0, %v831_v49, 0.0  ;;  %v832_v55 = vmax.f32 %v743_v52, 0.0  ;;  %v846_v49 = vmax.f32 %v3865_v15, 0.0  ;;  %v902_v52 = vsel %vm609_vm0, %v845_v47, 0.0  ;;  %v990_v47 = vld [vmem:[%s4605_s5 + $0x18] sm:$0xff] }
 0x102   : > { %v875_v56 = vadd.f32 %v874_v54, %v873_v51  ;;  %v880_v0 = vsel %vm609_vm0, %v834_v57, 0.0  ;;  %v850_v15 = vmax.f32 %v3877_v39, 0.0  ;;  %v910_v37 = vsel %vm609_vm0, %v849_v9, 0.0  ;;  %v1011_v39 = vld [vmem:[%s4605_s5 + $0xc0] sm:$0xff]  ;;  %v1005_v9 = vld [vmem:[%s4605_s5 + $0x90] sm:$0xff] }
 0x103   : > { %v876_v58 = vsel %vm609_vm0, %v832_v55, 0.0  ;;  %v904_v54 = vsel %vm609_vm0, %v846_v49, 0.0  ;;  %v906_v55 = vsel %vm609_vm0, %v847_v13, 0.0  ;;  %v998_v49 = vld [vmem:[%s4605_s5 + $0x58] sm:$0xff] }
 0x104   : > { %v877_v59 = vadd.f32 %v876_v58, %v875_v56  ;;  %v908_v58 = vsel %vm609_vm0, %v848_v18, 0.0  ;;  %v3153_v13 = vcombine.low %v990_v47, %v998_v49 }
 0x105   : > { %v3422_v61 = vpop.f32.mrb[16].mxu0 }
 0x106   : > { %v879_v62 = vadd.f32 %v878_v60, %v877_v59  ;;  %v756_v63 = vpop.f32.mrb[17].mxu0  ;;  %v837_v5 = vmax.f32 %v3422_v61, 0.0  ;;  %v912_v61 = vsel %vm609_vm0, %v850_v15, 0.0 }
 0x107   : > { %v835_v1 = vmax.f32 %v756_v63, 0.0  ;;  %v3423_v2 = vpop.f32.mrb[18].mxu0 }
 0x108   : > { %v881_v3 = vadd.f32 %v880_v0, %v879_v62  ;;  %v759_v4 = vpop.f32.mrb[19].mxu0  ;;  %v838_v10 = vmax.f32 %v3423_v2, 0.0  ;;  %v886_v14 = vsel %vm609_vm0, %v837_v5, 0.0 }
 0x109   : > { %v882_v6 = vsel %vm609_vm0, %v835_v1, 0.0  ;;  %v836_v7 = vmax.f32 %v759_v4, 0.0 }
 0x10a   : > { %v883_v8 = vadd.f32 %v882_v6, %v881_v3  ;;  %v888_v21 = vsel %vm609_vm0, %v838_v10, 0.0  ;;  %v3164_v6 = vcombine.high %v1003_v33, %v1011_v39  ;;  %v3163_v10 = vcombine.low %v1003_v33, %v1011_v39 }
 0x10b   : > { %v884_v11 = vsel %vm609_vm0, %v836_v7, 0.0  ;;  %v1019_v7 = vld [vmem:[%s4605_s5 + $0x100] sm:$0xff] }
 0x10c   : > { %v885_v12 = vadd.f32 %v884_v11, %v883_v8  ;;  %v1027_v8 = vld [vmem:[%s4605_s5 + $0x140] sm:$0xff] }
 0x10d   : > { %v3426_v16 = vpop.f32.mrb[20].mxu0  ;;  %v3180_v11 = vcombine.high %v1019_v7, %v1027_v8 }
 0x10e   : > { %v887_v17 = vadd.f32 %v886_v14, %v885_v12  ;;  %v772_v20 = vpop.f32.mrb[21].mxu0  ;;  %v841_v26 = vmax.f32 %v3426_v16, 0.0  ;;  %v1035_v12 = vld [vmem:[%s4605_s5 + $0x180] sm:$0xff]  ;;  %v3179_v16 = vcombine.low %v1019_v7, %v1027_v8  ;;  %v1038_v7 = vld [vmem:[%s4605_s5 + $0x198] sm:$0xff] }
 0x10f   : > { %v839_v22 = vmax.f32 %v772_v20, 0.0  ;;  %v3427_v23 = vpop.f32.mrb[22].mxu0  ;;  %v1043_v14 = vld [vmem:[%s4605_s5 + $0x1c0] sm:$0xff]  ;;  %v3212_v20 = vcombine.high %v1051_v30, %v1059_v31  ;;  %v1046_v8 = vld [vmem:[%s4605_s5 + $0x1d8] sm:$0xff] }
 0x110   : > { %v889_v24 = vadd.f32 %v888_v21, %v887_v17  ;;  %v775_v25 = vpop.f32.mrb[23].mxu0  ;;  %v842_v34 = vmax.f32 %v3427_v23, 0.0  ;;  %v894_v40 = vsel %vm609_vm0, %v841_v26, 0.0  ;;  %v3196_v17 = vcombine.high %v1035_v12, %v1043_v14  ;;  %v1067_v21 = vld [vmem:[%s4605_s5 + $0x280] sm:$0xff] }
 0x111   : > { %v890_v27 = vsel %vm609_vm0, %v839_v22, 0.0  ;;  %v840_v28 = vmax.f32 %v775_v25, 0.0  ;;  %v1075_v22 = vld [vmem:[%s4605_s5 + $0x2c0] sm:$0xff]  ;;  %v3211_v23 = vcombine.low %v1051_v30, %v1059_v31  ;;  %v1054_v30 = vld [vmem:[%s4605_s5 + $0x218] sm:$0xff] }
 0x112   : > { %v891_v29 = vadd.f32 %v890_v27, %v889_v24  ;;  %v896_v43 = vsel %vm609_vm0, %v842_v34, 0.0  ;;  %v3228_v24 = vcombine.high %v1067_v21, %v1075_v22  ;;  %v1083_v25 = vld [vmem:[%s4605_s5 + $0x300] sm:$0xff]  ;;  %v3227_v27 = vcombine.low %v1067_v21, %v1075_v22  ;;  %v1100_v34 = vld [vmem:[%s4605_s5 + $0x388] sm:$0xff]  ;;  %v1062_v31 = vld [vmem:[%s4605_s5 + $0x258] sm:$0xff] }
 0x113   : > { %v892_v35 = vsel %vm609_vm0, %v840_v28, 0.0  ;;  %v1091_v26 = vld [vmem:[%s4605_s5 + $0x340] sm:$0xff]  ;;  %v3218_v22 = vcombine.high %v1054_v30, %v1062_v31 }
 0x114   : > { %v893_v38 = vadd.f32 %v892_v35, %v891_v29  ;;  %v3244_v28 = vcombine.high %v1083_v25, %v1091_v26  ;;  %v3243_v29 = vcombine.low %v1083_v25, %v1091_v26  ;;  %v1108_v35 = vld [vmem:[%s4605_s5 + $0x3c8] sm:$0xff]  ;;  %v1070_v25 = vld [vmem:[%s4605_s5 + $0x298] sm:$0xff] }
 0x115   : > { %v1078_v26 = vld [vmem:[%s4605_s5 + $0x2d8] sm:$0xff] }
 0x116   : > { %v895_v41 = vadd.f32 %v894_v40, %v893_v38  ;;  %v3262_v38 = vcombine.high %v1100_v34, %v1108_v35  ;;  %v1107_v40 = vld [vmem:[%s4605_s5 + $0x3c0] sm:$0xff] }
 0x118   : > { %v897_v46 = vadd.f32 %v896_v43, %v895_v41  ;;  %v3261_v41 = vcombine.low %v1100_v34, %v1108_v35  ;;  %v3259_v43 = vcombine.low %v1099_v36, %v1107_v40  ;;  %1894 = vmatprep.subr.bf16.mxu0 %v3262_v38  ;;  %v3234_v34 = vcombine.high %v1070_v25, %v1078_v26  ;;  %v1085_v35 = vld [vmem:[%s4605_s5 + $0x310] sm:$0xff]  ;;  %v1086_v38 = vld [vmem:[%s4605_s5 + $0x318] sm:$0xff] }
 0x11a   : > { %v899_v48 = vadd.f32 %v898_v44, %v897_v46  ;;  %v3260_v44 = vcombine.high %v1099_v36, %v1107_v40  ;;  %1895 = vmatpush1.bf16.msra.mxu0 %v3261_v41  ;;  %v997_v46 = vld [vmem:[%s4605_s5 + $0x50] sm:$0xff]  ;;  %v1094_v40 = vld [vmem:[%s4605_s5 + $0x358] sm:$0xff] }
 0x11b   : > { %v1093_v36 = vld [vmem:[%s4605_s5 + $0x350] sm:$0xff] }
 0x11c   : > { %v901_v51 = vadd.f32 %v900_v50, %v899_v48  ;;  %v3152_v48 = vcombine.high %v989_v45, %v997_v46  ;;  %v3151_v50 = vcombine.low %v989_v45, %v997_v46  ;;  %v3250_v45 = vcombine.high %v1086_v38, %v1094_v40  ;;  %v1101_v46 = vld [vmem:[%s4605_s5 + $0x390] sm:$0xff] }
 0x11e   : > { %v903_v53 = vadd.f32 %v902_v52, %v901_v51  ;;  %v3154_v51 = vcombine.high %v990_v47, %v998_v49  ;;  %v3659_v52 = vmov 0   ;;  %v1109_v47 = vld [vmem:[%s4605_s5 + $0x3d0] sm:$0xff]  ;;  %v1110_v49 = vld [vmem:[%s4605_s5 + $0x3d8] sm:$0xff] }
 0x11f   : > { %1912 = vmatprep.mubr.bf16.mxu0 %v3659_v52 }
 0x120   : > { %v905_v56 = vadd.f32 %v904_v54, %v903_v53  ;;  %1962 = vmatprep.subr.bf16.mxu0 %v3154_v51  ;;  %v927_v53 = vld [vmem:[%s4604_s4] sm:$0x1]  ;;  %v3264_v51 = vcombine.high %v1101_v46, %v1109_v47 }
 0x122   : > { %v907_v57 = vadd.f32 %v906_v55, %v905_v56 }
 0x124   : > { %v909_v59 = vadd.f32 %v908_v58, %v907_v57  ;;  %v1013_v57 = vld [vmem:[%s4605_s5 + $0xd0] sm:$0xff] }
 0x126   : > { %v911_v60 = vadd.f32 %v910_v37, %v909_v59  ;;  %v1006_v59 = vld [vmem:[%s4605_s5 + $0x98] sm:$0xff] }
 0x127   : > { %v1014_v37 = vld [vmem:[%s4605_s5 + $0xd8] sm:$0xff] }
 0x128   : > { %v913_v62 = vadd.f32 %v912_v61, %v911_v60  ;;  %v3169_v33 = vcombine.low %v1006_v59, %v1014_v37 }
 0x12a   : > { %v914_v63 = vrot.slane %v913_v62, 4 }
 0x12c   : > { %v915_v0 = vadd.f32 %v914_v63, %v913_v62  ;;  %v3168_v62 = vcombine.high %v1005_v9, %v1013_v57  ;;  %v3170_v63 = vcombine.high %v1006_v59, %v1014_v37  ;;  %v1007_v59 = vld [vmem:[%s4605_s5 + $0xa0] sm:$0xff] }
 0x12d   : > { %v1015_v37 = vld [vmem:[%s4605_s5 + $0xe0] sm:$0xff] }
 0x12e   : > { %v916_v1 = vrot.slane %v915_v0, 2 }
 0x130   : > { %v917_v2 = vadd.f32 %v916_v1, %v915_v0  ;;  %v1021_v0 = vld [vmem:[%s4605_s5 + $0x110] sm:$0xff] }
 0x131   : > { %v1029_v1 = vld [vmem:[%s4605_s5 + $0x150] sm:$0xff] }
 0x132   : > { %v918_v42 = vrot.slane %v917_v2, 1  ;;  %v3184_v39 = vcombine.high %v1021_v0, %v1029_v1 }
 0x134   : > { %v919_v3 = vadd.f32 %v918_v42, %v917_v2  ;;  %v1022_v2 = vld [vmem:[%s4605_s5 + $0x118] sm:$0xff] }
 0x135   : > { %v1030_v42 = vld [vmem:[%s4605_s5 + $0x158] sm:$0xff] }
 0x136   : > { %v921_v4 = vmul.f32 0.00390625, %v919_v3  ;;  %v3167_v3 = vcombine.low %v1005_v9, %v1013_v57  ;;  %v3263_v9 = vcombine.low %v1101_v46, %v1109_v47 }
 0x138   : > { %v922_v5 = vpack.c.bf16 %v921_v4, %v921_v4  ;;  %v3186_v4 = vcombine.high %v1022_v2, %v1030_v42 }
 0x13a   : > { %3441 = vmatmul.mubr.msk.bf16.vlgmr.msra.gmra.mrb[8].mxu1 %vm609_vm0, %v922_v5  ;;  %v1037_v5 = vld [vmem:[%s4605_s5 + $0x190] sm:$0xff] }
 0x13b   : > { %1840 = vmatpush1.bf16.msra.mxu1 %v3147_v32  ;;  %v3195_v32 = vcombine.low %v1035_v12, %v1043_v14  ;;  %1871 = vmatprep.mubr.bf16.mxu1 %v3659_v52  ;;  %v3202_v14 = vcombine.high %v1038_v7, %v1046_v8 }
 0x13c   : > { %1841 = vmatprep.subr.bf16.mxu1 %v3164_v6  ;;  %v1045_v6 = vld [vmem:[%s4605_s5 + $0x1d0] sm:$0xff] }
 0x13d   : > { %v3200_v12 = vcombine.high %v1037_v5, %v1045_v6 }
 0x13f   : > { %1842 = vmatpush1.bf16.msra.mxu1 %v3163_v10  ;;  %v3183_v10 = vcombine.low %v1021_v0, %v1029_v1  ;;  %v3172_v1 = vcombine.high %v1007_v59, %v1015_v37 }
 0x140   : > { %1843 = vmatprep.subr.bf16.mxu1 %v3180_v11  ;;  %v3185_v11 = vcombine.low %v1022_v2, %v1030_v42  ;;  %v1023_v42 = vld [vmem:[%s4605_s5 + $0x120] sm:$0xff] }
 0x143   : > { %1844 = vmatpush1.bf16.msra.mxu1 %v3179_v16  ;;  %v1053_v16 = vld [vmem:[%s4605_s5 + $0x210] sm:$0xff] }
 0x144   : > { %1845 = vmatprep.subr.bf16.mxu1 %v3196_v17  ;;  %v1061_v17 = vld [vmem:[%s4605_s5 + $0x250] sm:$0xff] }
 0x145   : > { %v3216_v21 = vcombine.high %v1053_v16, %v1061_v17 }
 0x147   : > { %1846 = vmatpush1.bf16.msra.mxu1 %v3195_v32  ;;  %v3199_v32 = vcombine.low %v1037_v5, %v1045_v6 }
 0x148   : > { %1847 = vmatprep.subr.bf16.mxu1 %v3212_v20  ;;  %v3201_v20 = vcombine.low %v1038_v7, %v1046_v8  ;;  %v1039_v8 = vld [vmem:[%s4605_s5 + $0x1a0] sm:$0xff] }
 0x14b   : > { %1848 = vmatpush1.bf16.msra.mxu1 %v3211_v23  ;;  %v1069_v23 = vld [vmem:[%s4605_s5 + $0x290] sm:$0xff] }
 0x14c   : > { %1849 = vmatprep.subr.bf16.mxu1 %v3228_v24  ;;  %v1077_v24 = vld [vmem:[%s4605_s5 + $0x2d0] sm:$0xff] }
 0x14d   : > { %v3231_v41 = vcombine.low %v1069_v23, %v1077_v24 }
 0x14f   : > { %1850 = vmatpush1.bf16.msra.mxu1 %v3227_v27  ;;  %v3215_v27 = vcombine.low %v1053_v16, %v1061_v17 }
 0x150   : > { %1851 = vmatprep.subr.bf16.mxu1 %v3244_v28  ;;  %v3217_v28 = vcombine.low %v1054_v30, %v1062_v31  ;;  %v1055_v31 = vld [vmem:[%s4605_s5 + $0x220] sm:$0xff] }
 0x153   : > { %1852 = vmatpush1.bf16.msra.mxu1 %v3243_v29  ;;  %v3232_v29 = vcombine.high %v1069_v23, %v1077_v24 }
 0x154   : > { %1853 = vmatprep.subr.bf16.mxu1 %v3260_v44  ;;  %v3248_v44 = vcombine.high %v1085_v35, %v1093_v36 }
 0x157   : > { %1854 = vmatpush1.bf16.msra.mxu1 %v3259_v43  ;;  %v3233_v43 = vcombine.low %v1070_v25, %v1078_v26  ;;  %v1071_v26 = vld [vmem:[%s4605_s5 + $0x2a0] sm:$0xff] }
 0x158   : > { %1921 = vmatprep.subr.bf16.mxu1 %v3152_v48  ;;  %v1102_v48 = vld [vmem:[%s4605_s5 + $0x398] sm:$0xff] }
 0x159   : > { %v3265_v57 = vcombine.low %v1102_v48, %v1110_v49 }
 0x20d   : > { %v977_v54 = vpop.f32.mrb[8].mxu1 }
 0x20e   : > { %v978_v55 = vadd.f32 %v977_v54, %v927_v53  ;;  %v3442_v18 = vpop.f32.mrb[9].mxu1  ;;  %v3266_v53 = vcombine.high %v1102_v48, %v1110_v49  ;;  %v991_v54 = vld [vmem:[%s4605_s5 + $0x20] sm:$0xff] }
 0x20f   : > { %v980_v56 = vpop.f32.mrb[10].mxu1  ;;  %v992_v18 = vld [vmem:[%s4605_s5 + $0x28] sm:$0xff]  ;;  %v1103_v49 = vld [vmem:[%s4605_s5 + $0x3a0] sm:$0xff] }
 0x210   : > { %vm983_vm2 = vcmp.gt.f32.partialorder %v978_v55, 0.0  ;;  %v984_v15 = vmul.f32 0.2, %v978_v55  ;;  %v3443_v58 = vpop.f32.mrb[11].mxu1  ;;  %v1000_v56 = vld [vmem:[%s4605_s5 + $0x68] sm:$0xff] }
 0x211   : > { %v3158_v58 = vcombine.high %v992_v18, %v1000_v56  ;;  %v3157_v0 = vcombine.low %v992_v18, %v1000_v56  ;;  %v993_v56 = vld [vmem:[%s4605_s5 + $0x30] sm:$0xff] }
 0x212   : > { %v985_v60 = vsel %vm983_vm2, %v978_v55, %v984_v15  ;;  %v999_v55 = vld [vmem:[%s4605_s5 + $0x60] sm:$0xff] }
 0x213   : > { %v3993_v61 = vpack.c.bf16 %v985_v60, %v985_v60  ;;  %v3156_v15 = vcombine.high %v991_v54, %v999_v55  ;;  %v1008_v60 = vld [vmem:[%s4605_s5 + $0xa8] sm:$0xff] }
 0x215   : > { %1872 = vmatmul.mubr.bf16.vlgmr.msra.gmra.mrb[12].mxu1 %v3993_v61  ;;  %1913 = vmatmul.mubr.bf16.vlgmr.msra.gmra.mrb[24].mxu0 %v3993_v61 }
 0x216   : > { %1922 = vmatpush1.bf16.msra.mxu1 %v3151_v50  ;;  %1963 = vmatpush1.bf16.msra.mxu0 %v3153_v13  ;;  %v3247_v50 = vcombine.low %v1085_v35, %v1093_v36  ;;  %v3249_v13 = vcombine.low %v1086_v38, %v1094_v40  ;;  %v1087_v40 = vld [vmem:[%s4605_s5 + $0x320] sm:$0xff] }
 0x217   : > { %1923 = vmatprep.subr.bf16.mxu1 %v3168_v62  ;;  %1964 = vmatprep.subr.bf16.mxu0 %v3170_v63  ;;  %v1016_v62 = vld [vmem:[%s4605_s5 + $0xe8] sm:$0xff]  ;;  %v3155_v63 = vcombine.low %v991_v54, %v999_v55 }
 0x218   : > { %1953 = vmatprep.mubr.bf16.mxu1 %v3659_v52  ;;  %1994 = vmatprep.mubr.bf16.mxu0 %v3659_v52  ;;  %v3174_v2 = vcombine.high %v1008_v60, %v1016_v62  ;;  %v3173_v5 = vcombine.low %v1008_v60, %v1016_v62  ;;  %v1009_v62 = vld [vmem:[%s4605_s5 + $0xb0] sm:$0xff] }
 0x21a   : > { %1924 = vmatpush1.bf16.msra.mxu1 %v3167_v3  ;;  %1965 = vmatpush1.bf16.msra.mxu0 %v3169_v33  ;;  %v1031_v3 = vld [vmem:[%s4605_s5 + $0x160] sm:$0xff]  ;;  %v1024_v33 = vld [vmem:[%s4605_s5 + $0x128] sm:$0xff] }
 0x21b   : > { %1925 = vmatprep.subr.bf16.mxu1 %v3184_v39  ;;  %1966 = vmatprep.subr.bf16.mxu0 %v3186_v4  ;;  %v1032_v39 = vld [vmem:[%s4605_s5 + $0x168] sm:$0xff]  ;;  %v3171_v4 = vcombine.low %v1007_v59, %v1015_v37  ;;  %v3188_v6 = vcombine.high %v1023_v42, %v1031_v3 }
 0x21c   : > { %v3190_v7 = vcombine.high %v1024_v33, %v1032_v39  ;;  %v3189_v16 = vcombine.low %v1024_v33, %v1032_v39  ;;  %v1025_v39 = vld [vmem:[%s4605_s5 + $0x130] sm:$0xff] }
 0x21e   : > { %1926 = vmatpush1.bf16.msra.mxu1 %v3183_v10  ;;  %1967 = vmatpush1.bf16.msra.mxu0 %v3185_v11  ;;  %v1047_v10 = vld [vmem:[%s4605_s5 + $0x1e0] sm:$0xff]  ;;  %v1040_v11 = vld [vmem:[%s4605_s5 + $0x1a8] sm:$0xff] }
 0x21f   : > { %1927 = vmatprep.subr.bf16.mxu1 %v3200_v12  ;;  %1968 = vmatprep.subr.bf16.mxu0 %v3202_v14  ;;  %v1048_v12 = vld [vmem:[%s4605_s5 + $0x1e8] sm:$0xff]  ;;  %v3187_v14 = vcombine.low %v1023_v42, %v1031_v3  ;;  %v3204_v17 = vcombine.high %v1039_v8, %v1047_v10 }
 0x220   : > { %v3206_v30 = vcombine.high %v1040_v11, %v1048_v12  ;;  %v3205_v23 = vcombine.low %v1040_v11, %v1048_v12  ;;  %v1041_v12 = vld [vmem:[%s4605_s5 + $0x1b0] sm:$0xff] }
 0x222   : > { %1928 = vmatpush1.bf16.msra.mxu1 %v3199_v32  ;;  %1969 = vmatpush1.bf16.msra.mxu0 %v3201_v20  ;;  %v1063_v32 = vld [vmem:[%s4605_s5 + $0x260] sm:$0xff]  ;;  %v1056_v20 = vld [vmem:[%s4605_s5 + $0x228] sm:$0xff] }
 0x223   : > { %1929 = vmatprep.subr.bf16.mxu1 %v3216_v21  ;;  %1970 = vmatprep.subr.bf16.mxu0 %v3218_v22  ;;  %v1064_v21 = vld [vmem:[%s4605_s5 + $0x268] sm:$0xff]  ;;  %v3203_v22 = vcombine.low %v1039_v8, %v1047_v10  ;;  %v3220_v24 = vcombine.high %v1055_v31, %v1063_v32 }
 0x224   : > { %v3222_v25 = vcombine.high %v1056_v20, %v1064_v21  ;;  %v3221_v35 = vcombine.low %v1056_v20, %v1064_v21  ;;  %v1057_v21 = vld [vmem:[%s4605_s5 + $0x230] sm:$0xff] }
 0x226   : > { %1930 = vmatpush1.bf16.msra.mxu1 %v3215_v27  ;;  %1971 = vmatpush1.bf16.msra.mxu0 %v3217_v28  ;;  %v1079_v27 = vld [vmem:[%s4605_s5 + $0x2e0] sm:$0xff]  ;;  %v1072_v28 = vld [vmem:[%s4605_s5 + $0x2a8] sm:$0xff] }
 0x227   : > { %1931 = vmatprep.subr.bf16.mxu1 %v3232_v29  ;;  %1972 = vmatprep.subr.bf16.mxu0 %v3234_v34  ;;  %v1080_v29 = vld [vmem:[%s4605_s5 + $0x2e8] sm:$0xff]  ;;  %v3219_v34 = vcombine.low %v1055_v31, %v1063_v32  ;;  %v3236_v36 = vcombine.high %v1071_v26, %v1079_v27 }
 0x228   : > { %v3238_v38 = vcombine.high %v1072_v28, %v1080_v29  ;;  %v3237_v46 = vcombine.low %v1072_v28, %v1080_v29  ;;  %v1073_v29 = vld [vmem:[%s4605_s5 + $0x2b0] sm:$0xff] }
 0x22a   : > { %1932 = vmatpush1.bf16.msra.mxu1 %v3231_v41  ;;  %1973 = vmatpush1.bf16.msra.mxu0 %v3233_v43  ;;  %v1095_v41 = vld [vmem:[%s4605_s5 + $0x360] sm:$0xff]  ;;  %v1088_v43 = vld [vmem:[%s4605_s5 + $0x328] sm:$0xff] }
 0x22b   : > { %1933 = vmatprep.subr.bf16.mxu1 %v3248_v44  ;;  %1974 = vmatprep.subr.bf16.mxu0 %v3250_v45  ;;  %v1096_v44 = vld [vmem:[%s4605_s5 + $0x368] sm:$0xff]  ;;  %v3235_v45 = vcombine.low %v1071_v26, %v1079_v27  ;;  %v3252_v47 = vcombine.high %v1087_v40, %v1095_v41 }
 0x22c   : > { %v3254_v48 = vcombine.high %v1088_v43, %v1096_v44  ;;  %v3253_v54 = vcombine.low %v1088_v43, %v1096_v44  ;;  %v1089_v44 = vld [vmem:[%s4605_s5 + $0x330] sm:$0xff] }
 0x22e   : > { %1934 = vmatpush1.bf16.msra.mxu1 %v3247_v50  ;;  %1975 = vmatpush1.bf16.msra.mxu0 %v3249_v13  ;;  %v1111_v50 = vld [vmem:[%s4605_s5 + $0x3e0] sm:$0xff]  ;;  %v1104_v13 = vld [vmem:[%s4605_s5 + $0x3a8] sm:$0xff] }
 0x22f   : > { %1935 = vmatprep.subr.bf16.mxu1 %v3264_v51  ;;  %1976 = vmatprep.subr.bf16.mxu0 %v3266_v53  ;;  %v1112_v51 = vld [vmem:[%s4605_s5 + $0x3e8] sm:$0xff]  ;;  %v3251_v53 = vcombine.low %v1087_v40, %v1095_v41  ;;  %v3268_v55 = vcombine.high %v1103_v49, %v1111_v50 }
 0x230   : > { %v3270_v18 = vcombine.high %v1104_v13, %v1112_v51  ;;  %v3269_v59 = vcombine.low %v1104_v13, %v1112_v51  ;;  %v1105_v51 = vld [vmem:[%s4605_s5 + $0x3b0] sm:$0xff] }
 0x232   : > { %1936 = vmatpush1.bf16.msra.mxu1 %v3263_v9  ;;  %1977 = vmatpush1.bf16.msra.mxu0 %v3265_v57  ;;  %v1001_v9 = vld [vmem:[%s4605_s5 + $0x70] sm:$0xff]  ;;  %v994_v57 = vld [vmem:[%s4605_s5 + $0x38] sm:$0xff] }
 0x233   : > { %2003 = vmatprep.subr.bf16.mxu1 %v3156_v15  ;;  %2044 = vmatprep.subr.bf16.mxu0 %v3158_v58  ;;  %v1002_v15 = vld [vmem:[%s4605_s5 + $0x78] sm:$0xff]  ;;  %v3267_v58 = vcombine.low %v1103_v49, %v1111_v50  ;;  %v3160_v37 = vcombine.high %v993_v56, %v1001_v9 }
 0x234   : > { %v3162_v60 = vcombine.high %v994_v57, %v1002_v15  ;;  %v3161_v42 = vcombine.low %v994_v57, %v1002_v15 }
 0x235   : > { %1954 = vmatmul.mubr.bf16.vlgmr.msra.gmra.mrb[16].mxu1 %v3993_v61  ;;  %1995 = vmatmul.mubr.bf16.vlgmr.msra.gmra.mrb[28].mxu0 %v3993_v61 }
 0x236   : > { %2004 = vmatpush1.bf16.msra.mxu1 %v3155_v63  ;;  %2045 = vmatpush1.bf16.msra.mxu0 %v3157_v0  ;;  %v1017_v63 = vld [vmem:[%s4605_s5 + $0xf0] sm:$0xff]  ;;  %v1010_v0 = vld [vmem:[%s4605_s5 + $0xb8] sm:$0xff] }
 0x237   : > { %2005 = vmatprep.subr.bf16.mxu1 %v3172_v1  ;;  %2046 = vmatprep.subr.bf16.mxu0 %v3174_v2  ;;  %v1018_v1 = vld [vmem:[%s4605_s5 + $0xf8] sm:$0xff]  ;;  %v3159_v2 = vcombine.low %v993_v56, %v1001_v9  ;;  %v3176_v3 = vcombine.high %v1009_v62, %v1017_v63 }
 0x238   : > { %2035 = vmatprep.mubr.bf16.mxu1 %v3659_v52  ;;  %2076 = vmatprep.mubr.bf16.mxu0 %v3659_v52  ;;  %v3178_v33 = vcombine.high %v1010_v0, %v1018_v1  ;;  %v3177_v8 = vcombine.low %v1010_v0, %v1018_v1  ;;  %v3547_v0 = vld [vmem:[%s4608_s8 + $0x18] sm:$0xff]  }
 0x239   : > { %v3548_v1 = vld [vmem:[%s4607_s7 + $0x18] sm:$0xff]  }
 0x23a   : > { %2006 = vmatpush1.bf16.msra.mxu1 %v3171_v4  ;;  %2047 = vmatpush1.bf16.msra.mxu0 %v3173_v5  ;;  %v1033_v4 = vld [vmem:[%s4605_s5 + $0x170] sm:$0xff]  ;;  %v1026_v5 = vld [vmem:[%s4605_s5 + $0x138] sm:$0xff] }
 0x23b   : > { %2007 = vmatprep.subr.bf16.mxu1 %v3188_v6  ;;  %2048 = vmatprep.subr.bf16.mxu0 %v3190_v7  ;;  %v1034_v6 = vld [vmem:[%s4605_s5 + $0x178] sm:$0xff]  ;;  %v3175_v7 = vcombine.low %v1009_v62, %v1017_v63  ;;  %v3192_v10 = vcombine.high %v1025_v39, %v1033_v4  ;;  %v3545_v62 = vld [vmem:[%s4608_s8 + $0x10] sm:$0xff]  }
 0x23c   : > { %v3194_v11 = vcombine.high %v1026_v5, %v1034_v6  ;;  %v3193_v31 = vcombine.low %v1026_v5, %v1034_v6  ;;  %v3546_v63 = vld [vmem:[%s4607_s7 + $0x10] sm:$0xff]   ;;  %v3555_v5 = vld [vmem:[%s4608_s8 + $0x38] sm:$0xff]  }
 0x23d   : > { %v3556_v6 = vld [vmem:[%s4607_s7 + $0x38] sm:$0xff]  }
 0x23e   : > { %2008 = vmatpush1.bf16.msra.mxu1 %v3187_v14  ;;  %2049 = vmatpush1.bf16.msra.mxu0 %v3189_v16  ;;  %v1049_v14 = vld [vmem:[%s4605_s5 + $0x1f0] sm:$0xff]  ;;  %v1042_v16 = vld [vmem:[%s4605_s5 + $0x1b8] sm:$0xff] }
 0x23f   : > { %2009 = vmatprep.subr.bf16.mxu1 %v3204_v17  ;;  %2050 = vmatprep.subr.bf16.mxu0 %v3206_v30  ;;  %v1050_v17 = vld [vmem:[%s4605_s5 + $0x1f8] sm:$0xff]  ;;  %v3191_v30 = vcombine.low %v1025_v39, %v1033_v4  ;;  %v3208_v32 = vcombine.high %v1041_v12, %v1049_v14  ;;  %v3553_v39 = vld [vmem:[%s4608_s8 + $0x30] sm:$0xff]  }
 0x240   : > { %v3210_v20 = vcombine.high %v1042_v16, %v1050_v17  ;;  %v3209_v26 = vcombine.low %v1042_v16, %v1050_v17  ;;  %v3554_v4 = vld [vmem:[%s4607_s7 + $0x30] sm:$0xff]   ;;  %v3560_v16 = vld [vmem:[%s4610_s10 + $0x18] sm:$0xff]  }
 0x242   : > { %2010 = vmatpush1.bf16.msra.mxu1 %v3203_v22  ;;  %2051 = vmatpush1.bf16.msra.mxu0 %v3205_v23  ;;  %v1065_v22 = vld [vmem:[%s4605_s5 + $0x270] sm:$0xff]  ;;  %v1058_v23 = vld [vmem:[%s4605_s5 + $0x238] sm:$0xff] }
 0x243   : > { %2011 = vmatprep.subr.bf16.mxu1 %v3220_v24  ;;  %2052 = vmatprep.subr.bf16.mxu0 %v3222_v25  ;;  %v1066_v24 = vld [vmem:[%s4605_s5 + $0x278] sm:$0xff]  ;;  %v3207_v25 = vcombine.low %v1041_v12, %v1049_v14  ;;  %v3224_v27 = vcombine.high %v1057_v21, %v1065_v22  ;;  %v3559_v12 = vld [vmem:[%s4610_s10 + $0x10] sm:$0xff]  }
 0x244   : > { %v3226_v28 = vcombine.high %v1058_v23, %v1066_v24  ;;  %v3225_v40 = vcombine.low %v1058_v23, %v1066_v24 }
 0x246   : > { %2012 = vmatpush1.bf16.msra.mxu1 %v3219_v34  ;;  %2053 = vmatpush1.bf16.msra.mxu0 %v3221_v35  ;;  %v1081_v34 = vld [vmem:[%s4605_s5 + $0x2f0] sm:$0xff]  ;;  %v1074_v35 = vld [vmem:[%s4605_s5 + $0x2b8] sm:$0xff] }
 0x247   : > { %2013 = vmatprep.subr.bf16.mxu1 %v3236_v36  ;;  %2054 = vmatprep.subr.bf16.mxu0 %v3238_v38  ;;  %v1082_v36 = vld [vmem:[%s4605_s5 + $0x2f8] sm:$0xff]  ;;  %v3223_v38 = vcombine.low %v1057_v21, %v1065_v22  ;;  %v3240_v41 = vcombine.high %v1073_v29, %v1081_v34 }
 0x248   : > { %v3242_v43 = vcombine.high %v1074_v35, %v1082_v36  ;;  %v3241_v49 = vcombine.low %v1074_v35, %v1082_v36 }
 0x24a   : > { %2014 = vmatpush1.bf16.msra.mxu1 %v3235_v45  ;;  %2055 = vmatpush1.bf16.msra.mxu0 %v3237_v46  ;;  %v1097_v45 = vld [vmem:[%s4605_s5 + $0x370] sm:$0xff]  ;;  %v1090_v46 = vld [vmem:[%s4605_s5 + $0x338] sm:$0xff] }
 0x24b   : > { %2015 = vmatprep.subr.bf16.mxu1 %v3252_v47  ;;  %2056 = vmatprep.subr.bf16.mxu0 %v3254_v48  ;;  %v1098_v47 = vld [vmem:[%s4605_s5 + $0x378] sm:$0xff]  ;;  %v3239_v48 = vcombine.low %v1073_v29, %v1081_v34  ;;  %v3256_v50 = vcombine.high %v1089_v44, %v1097_v45 }
 0x24c   : > { %v3258_v13 = vcombine.high %v1090_v46, %v1098_v47  ;;  %v3257_v56 = vcombine.low %v1090_v46, %v1098_v47 }
 0x24e   : > { %2016 = vmatpush1.bf16.msra.mxu1 %v3251_v53  ;;  %2057 = vmatpush1.bf16.msra.mxu0 %v3253_v54  ;;  %v1113_v53 = vld [vmem:[%s4605_s5 + $0x3f0] sm:$0xff]  ;;  %v1106_v54 = vld [vmem:[%s4605_s5 + $0x3b8] sm:$0xff] }
 0x24f   : > { %2017 = vmatprep.subr.bf16.mxu1 %v3268_v55  ;;  %2058 = vmatprep.subr.bf16.mxu0 %v3270_v18  ;;  %v1114_v55 = vld [vmem:[%s4605_s5 + $0x3f8] sm:$0xff]  ;;  %v3255_v18 = vcombine.low %v1089_v44, %v1097_v45  ;;  %v3272_v9 = vcombine.high %v1105_v51, %v1113_v53  ;;  %v3271_v15 = vcombine.low %v1105_v51, %v1113_v53 }
 0x250   : > { %v3274_v57 = vcombine.high %v1106_v54, %v1114_v55 }
 0x252   : > { %2018 = vmatpush1.bf16.msra.mxu1 %v3267_v58  ;;  %2059 = vmatpush1.bf16.msra.mxu0 %v3269_v59  ;;  %v3273_v58 = vcombine.low %v1106_v54, %v1114_v55  ;;  %v3541_v59 = vld [vmem:[%s4608_s8] sm:$0xff]  }
 0x253   : > { %2085 = vmatprep.subr.bf16.mxu1 %v3160_v37  ;;  %2126 = vmatprep.subr.bf16.mxu0 %v3162_v60  ;;  %v3542_v37 = vld [vmem:[%s4607_s7] sm:$0xff]   ;;  %v3544_v60 = vld [vmem:[%s4607_s7 + $0x8] sm:$0xff]  }
 0x255   : > { %2036 = vmatmul.mubr.bf16.vlgmr.msra.gmra.mrb[20].mxu1 %v3993_v61  ;;  %2077 = vmatmul.mubr.bf16.vlgmr.msra.gmra.mrb[32].mxu0 %v3993_v61 }
 0x256   : > { %2086 = vmatpush1.bf16.msra.mxu1 %v3159_v2  ;;  %2127 = vmatpush1.bf16.msra.mxu0 %v3161_v42  ;;  %v3549_v2 = vld [vmem:[%s4608_s8 + $0x20] sm:$0xff]  }
 0x257   : > { %2087 = vmatprep.subr.bf16.mxu1 %v3176_v3  ;;  %2128 = vmatprep.subr.bf16.mxu0 %v3178_v33  ;;  %v3550_v42 = vld [vmem:[%s4607_s7 + $0x20] sm:$0xff]   ;;  %v3551_v3 = vld [vmem:[%s4608_s8 + $0x28] sm:$0xff]  }
 0x258   : > { %2117 = vmatprep.mubr.bf16.mxu1 %v3659_v52  ;;  %2158 = vmatprep.mubr.bf16.mxu0 %v3659_v52  ;;  %v3552_v33 = vld [vmem:[%s4607_s7 + $0x28] sm:$0xff]  }
 0x25a   : > { %2088 = vmatpush1.bf16.msra.mxu1 %v3175_v7  ;;  %2129 = vmatpush1.bf16.msra.mxu0 %v3177_v8  ;;  %v2185_v7 = vld [vmem:[%s475_s23] sm:$0x1] }
 0x25b   : > { %2089 = vmatprep.subr.bf16.mxu1 %v3192_v10  ;;  %2130 = vmatprep.subr.bf16.mxu0 %v3194_v11  ;;  %v3557_v8 = vld [vmem:[%s4610_s10] sm:$0xff]   ;;  %v3558_v10 = vld [vmem:[%s4610_s10 + $0x8] sm:$0xff]   ;;  %v1759_v11 = vlaneseq }
 0x25d   : > { %v4359_v14 = vshrl.u32 %v1759_v11, 7  ;;  %vm3038_vm5 = vcmp.lt.s32.totalorder %v1759_v11, 768 }
 0x25e   : > { %2090 = vmatpush1.bf16.msra.mxu1 %v3191_v30  ;;  %2131 = vmatpush1.bf16.msra.mxu0 %v3193_v31  ;;  %v1115_v31 = vld [vmem:[%s4606_s6] sm:$0xff] }
 0x25f   : > { %2091 = vmatprep.subr.bf16.mxu1 %v3208_v32  ;;  %2132 = vmatprep.subr.bf16.mxu0 %v3210_v20  ;;  %v4366_v17 = vsub.s32 0, %v4359_v14  ;;  %v4369_v30 = vsub.s32 2, %v4359_v14  ;;  %v4376_v32 = vsub.s32 1, %v4359_v14  ;;  %v4379_v20 = vsub.s32 3, %v4359_v14 }
 0x260   : > { %v4387_v44 = vsub.s32 4, %v4359_v14  ;;  %v1785_v45 = vsub.s32 6, %v4359_v14  ;;  %v4391_v46 = vsub.s32 5, %v4359_v14  ;;  %v1789_v47 = vsub.s32 7, %v4359_v14 }
 0x261   : > { %v1762_v21 = vrot.slane %v1115_v31, %v4366_v17  ;;  %v1770_v22 = vrot.slane %v1115_v31, %v4369_v30  ;;  %v1766_v23 = vrot.slane %v1115_v31, %v4376_v32  ;;  %v1774_v24 = vrot.slane %v1115_v31, %v4379_v20 }
 0x262   : > { %2092 = vmatpush1.bf16.msra.mxu1 %v3207_v25  ;;  %2133 = vmatpush1.bf16.msra.mxu0 %v3209_v26 }
 0x263   : > { %2093 = vmatprep.subr.bf16.mxu1 %v3224_v27  ;;  %2134 = vmatprep.subr.bf16.mxu0 %v3226_v28 }
 0x266   : > { %2094 = vmatpush1.bf16.msra.mxu1 %v3223_v38  ;;  %2135 = vmatpush1.bf16.msra.mxu0 %v3225_v40 }
 0x267   : > { %2095 = vmatprep.subr.bf16.mxu1 %v3240_v41  ;;  %2136 = vmatprep.subr.bf16.mxu0 %v3242_v43 }
 0x26a   : > { %2096 = vmatpush1.bf16.msra.mxu1 %v3239_v48  ;;  %2137 = vmatpush1.bf16.msra.mxu0 %v3241_v49  ;;  %v1778_v48 = vrot.slane %v1115_v31, %v4387_v44  ;;  %v1786_v49 = vrot.slane %v1115_v31, %v1785_v45 }
 0x26b   : > { %2097 = vmatprep.subr.bf16.mxu1 %v3256_v50  ;;  %2138 = vmatprep.subr.bf16.mxu0 %v3258_v13  ;;  %v1782_v50 = vrot.slane %v1115_v31, %v4391_v46  ;;  %v1790_v13 = vrot.slane %v1115_v31, %v1789_v47 }
 0x26e   : > { %2098 = vmatpush1.bf16.msra.mxu1 %v3255_v18  ;;  %2139 = vmatpush1.bf16.msra.mxu0 %v3257_v56 }
 0x26f   : > { %2099 = vmatprep.subr.bf16.mxu1 %v3272_v9  ;;  %2140 = vmatprep.subr.bf16.mxu0 %v3274_v57 }
 0x272   : > { %2100 = vmatpush1.bf16.msra.mxu1 %v3271_v15  ;;  %2141 = vmatpush1.bf16.msra.mxu0 %v3273_v58 }
 0x273   : > { %3444 = vmatprep.subr.bf16.mxu1 %v3657_v19  ;;  %3464 = vmatprep.subr.bf16.mxu0 %v3657_v19 }
 0x275   : > { %2118 = vmatmul.mubr.bf16.vlgmr.msra.gmra.mrb[24].mxu1 %v3993_v61  ;;  %2159 = vmatmul.mubr.bf16.vlgmr.msra.gmra.mrb[36].mxu0 %v3993_v61  ;;  %v3543_v61 = vld [vmem:[%s4608_s8 + $0x8] sm:$0xff]  }
 0x276   : > { %3460 = vmatprep.mubr.msk.bf16.mxu1 %vm3658_vm1, %v3657_v19  ;;  %3480 = vmatprep.mubr.msk.bf16.mxu0 %vm3658_vm1, %v3657_v19 }
 0x277   : > { %3445 = vmatpush3.bf16.msra.mxu1 %v3541_v59  ;;  %3465 = vmatpush3.bf16.msra.mxu0 %v3542_v37 }
 0x278   : > { %3446 = vmatprep.subr.bf16.mxu1 %v3657_v19  ;;  %3466 = vmatprep.subr.bf16.mxu0 %v3657_v19 }
 0x27b   : > { %3447 = vmatpush3.bf16.msra.mxu1 %v3543_v61  ;;  %3467 = vmatpush3.bf16.msra.mxu0 %v3544_v60  ;;  %v1116_v61 = vld [vmem:[%s4606_s6 + $0x8] sm:$0xff] }
 0x27c   : > { %3448 = vmatprep.subr.bf16.mxu1 %v3657_v19  ;;  %3468 = vmatprep.subr.bf16.mxu0 %v3657_v19  ;;  %v1794_v60 = vrot.slane %v1116_v61, %v4366_v17  ;;  %v1818_v31 = vrot.slane %v1116_v61, %v1785_v45 }
 0x27f   : > { %3449 = vmatpush3.bf16.msra.mxu1 %v3545_v62  ;;  %3469 = vmatpush3.bf16.msra.mxu0 %v3546_v63  ;;  %v1802_v62 = vrot.slane %v1116_v61, %v4369_v30  ;;  %v1798_v63 = vrot.slane %v1116_v61, %v4376_v32 }
 0x280   : > { %3450 = vmatprep.subr.bf16.mxu1 %v3657_v19  ;;  %3470 = vmatprep.subr.bf16.mxu0 %v3657_v19 }
 0x283   : > { %3451 = vmatpush3.bf16.msra.mxu1 %v3547_v0  ;;  %3471 = vmatpush3.bf16.msra.mxu0 %v3548_v1  ;;  %v1806_v0 = vrot.slane %v1116_v61, %v4379_v20  ;;  %v3561_v1 = vld [vmem:[%s4610_s10 + $0x20] sm:$0xff]  }
 0x284   : > { %3452 = vmatprep.subr.bf16.mxu1 %v3657_v19  ;;  %3472 = vmatprep.subr.bf16.mxu0 %v3657_v19 }
 0x287   : > { %3453 = vmatpush3.bf16.msra.mxu1 %v3549_v2  ;;  %3473 = vmatpush3.bf16.msra.mxu0 %v3550_v42 }
 0x288   : > { %3454 = vmatprep.subr.bf16.mxu1 %v3657_v19  ;;  %3474 = vmatprep.subr.bf16.mxu0 %v3657_v19 }
 0x28b   : > { %3455 = vmatpush3.bf16.msra.mxu1 %v3551_v3  ;;  %3475 = vmatpush3.bf16.msra.mxu0 %v3552_v33 }
 0x28c   : > { %3456 = vmatprep.subr.bf16.mxu1 %v3657_v19  ;;  %3476 = vmatprep.subr.bf16.mxu0 %v3657_v19 }
 0x28f   : > { %3457 = vmatpush3.bf16.msra.mxu1 %v3553_v39  ;;  %3477 = vmatpush3.bf16.msra.mxu0 %v3554_v4 }
 0x290   : > { %3458 = vmatprep.subr.bf16.mxu1 %v3657_v19  ;;  %3478 = vmatprep.subr.bf16.mxu0 %v3657_v19 }
 0x293   : > { %3459 = vmatpush3.bf16.msra.mxu1 %v3555_v5  ;;  %3479 = vmatpush3.bf16.msra.mxu0 %v3556_v6 }
 0x294   : > { %3484 = vmatprep.subr.bf16.mxu1 %v3657_v19 }
 0x296   : > { %3461 = vmatmul.mubr.bf16.vlgmr.msra.gmra.mrb[28].mxu1 %v2185_v7 }
 0x297   : > { %3500 = vmatprep.mubr.msk.bf16.mxu1 %vm3658_vm1, %v3657_v19  ;;  %3485 = vmatpush3.bf16.msra.mxu1 %v3557_v8 }
 0x298   : > { %3486 = vmatprep.subr.bf16.mxu1 %v3657_v19 }
 0x29b   : > { %3487 = vmatpush3.bf16.msra.mxu1 %v3558_v10 }
 0x29c   : > { %3488 = vmatprep.subr.bf16.mxu1 %v3657_v19 }
 0x29f   : > { %3489 = vmatpush3.bf16.msra.mxu1 %v3559_v12 }
 0x2a0   : > { %3490 = vmatprep.subr.bf16.mxu1 %v3657_v19 }
 0x2a3   : > { %3491 = vmatpush3.bf16.msra.mxu1 %v3560_v16  ;;  %v1810_v16 = vrot.slane %v1116_v61, %v4387_v44 }
 0x2a4   : > { %3492 = vmatprep.subr.bf16.mxu1 %v3657_v19 }
 0x2a7   : > { %3493 = vmatpush3.bf16.msra.mxu1 %v3561_v1 }
 0x2a8   : > { %3494 = vmatprep.subr.bf16.mxu1 %v3657_v19 }
 0x2e8   : > { %v1873_v25 = vpop.f32.mrb[12].mxu1  ;;  %v1914_v26 = vpop.f32.mrb[24].mxu0 }
 0x2e9   : > { %v1874_v27 = vadd.f32 %v1873_v25, %v1762_v21  ;;  %v1915_v28 = vadd.f32 %v1914_v26, %v1770_v22  ;;  %v1875_v29 = vpop.f32.mrb[13].mxu1  ;;  %v1916_v34 = vpop.f32.mrb[25].mxu0  ;;  %v1814_v21 = vrot.slane %v1116_v61, %v4391_v46  ;;  %v1822_v22 = vrot.slane %v1116_v61, %v1789_v47 }
 0x2ea   : > { %v1876_v35 = vadd.f32 %v1875_v29, %v1766_v23  ;;  %v1917_v36 = vadd.f32 %v1916_v34, %v1774_v24  ;;  %v1877_v38 = vpop.f32.mrb[14].mxu1  ;;  %v1918_v40 = vpop.f32.mrb[26].mxu0 }
 0x2eb   : > { %2167 = vst [vmem:[#allocation2] sm:$0x1] %v1874_v27  ;;  %2169 = vst [vmem:[#allocation2 + $0x2] sm:$0x1] %v1915_v28  ;;  %v1878_v41 = vpop.f32.mrb[15].mxu1  ;;  %v1919_v43 = vpop.f32.mrb[27].mxu0 }
 0x2ec   : > { %2168 = vst [vmem:[#allocation2 + $0x1] sm:$0x1] %v1876_v35  ;;  %2170 = vst [vmem:[#allocation2 + $0x3] sm:$0x1] %v1917_v36 }
 0x308   : > { %v1955_v51 = vpop.f32.mrb[16].mxu1  ;;  %v1996_v53 = vpop.f32.mrb[28].mxu0 }
 0x309   : > { %v1956_v54 = vadd.f32 %v1955_v51, %v1778_v48  ;;  %v1997_v55 = vadd.f32 %v1996_v53, %v1786_v49  ;;  %v1957_v18 = vpop.f32.mrb[17].mxu1  ;;  %v1998_v56 = vpop.f32.mrb[29].mxu0  ;;  %v3563_v51 = vld [vmem:[%s4610_s10 + $0x30] sm:$0xff]   ;;  %v3564_v53 = vld [vmem:[%s4610_s10 + $0x38] sm:$0xff]  }
 0x30a   : > { %v1958_v9 = vadd.f32 %v1957_v18, %v1782_v50  ;;  %v1999_v57 = vadd.f32 %v1998_v56, %v1790_v13  ;;  %v1959_v15 = vpop.f32.mrb[18].mxu1  ;;  %v2000_v58 = vpop.f32.mrb[30].mxu0  ;;  %v3562_v50 = vld [vmem:[%s4610_s10 + $0x28] sm:$0xff]  }
 0x30b   : > { %2171 = vst [vmem:[#allocation2 + $0x4] sm:$0x1] %v1956_v54  ;;  %2173 = vst [vmem:[#allocation2 + $0x6] sm:$0x1] %v1997_v55  ;;  %v1960_v59 = vpop.f32.mrb[19].mxu1  ;;  %v2001_v37 = vpop.f32.mrb[31].mxu0  ;;  %3495 = vmatpush3.bf16.msra.mxu1 %v3562_v50 }
 0x30c   : > { %2172 = vst [vmem:[#allocation2 + $0x5] sm:$0x1] %v1958_v9  ;;  %2174 = vst [vmem:[#allocation2 + $0x7] sm:$0x1] %v1999_v57  ;;  %3496 = vmatprep.subr.bf16.mxu1 %v3657_v19  ;;  %v3565_v54 = vld [vmem:[%s4612_s12] ss:$24 sps:$4 sm:$0xff]  }
 0x30d   : > { %v3567_v55 = vld [vmem:[%s4612_s12 + $0x4] ss:$24 sps:$4 sm:$0xff]   ;;  %v3571_v56 = vld [vmem:[%s4612_s12 + $0x30] ss:$24 sps:$4 sm:$0xff]   ;;  %v3291_v15 = vld [vmem:[%s4609_s9] ss:$0 sm:$0xff] }
 0x30e   : > { %v3570_v18 = vld [vmem:[%s4612_s12 + $0xc] ss:$24 sps:$4 sm:$0xff]   ;;  %2860 = vmatprep.subr.bf16.mxu0 %v3567_v55 }
 0x30f   : > { %3497 = vmatpush3.bf16.msra.mxu1 %v3563_v51 }
 0x310   : > { %3498 = vmatprep.subr.bf16.mxu1 %v3657_v19  ;;  %v3573_v19 = vld [vmem:[%s4612_s12 + $0x34] ss:$24 sps:$4 sm:$0xff]  }
 0x313   : > { %v4409_v41 = vld [vmem:[#allocation2] sm:$0xff]  ;;  %3499 = vmatpush3.bf16.msra.mxu1 %v3564_v53 }
 0x314   : > { %2901 = vmatprep.subr.bf16.mxu1 %v3570_v18 }
 0x328   : > { %v2037_v2 = vpop.f32.mrb[20].mxu1  ;;  %v2078_v42 = vpop.f32.mrb[32].mxu0 }
 0x329   : > { %v2038_v3 = vadd.f32 %v2037_v2, %v1794_v60  ;;  %v2079_v33 = vadd.f32 %v2078_v42, %v1802_v62  ;;  %v2039_v39 = vpop.f32.mrb[21].mxu1  ;;  %v2080_v4 = vpop.f32.mrb[33].mxu0 }
 0x32a   : > { %v2040_v5 = vadd.f32 %v2039_v39, %v1798_v63  ;;  %v2081_v6 = vadd.f32 %v2080_v4, %v1806_v0  ;;  %v2041_v7 = vpop.f32.mrb[22].mxu1  ;;  %v2082_v8 = vpop.f32.mrb[34].mxu0  ;;  %v3576_v39 = vld [vmem:[%s4612_s12 + $0x3c] ss:$24 sps:$4 sm:$0xff]   ;;  %v3574_v4 = vld [vmem:[%s4612_s12 + $0x38] ss:$24 sps:$4 sm:$0xff]  }
 0x32b   : > { %2175 = vst [vmem:[#allocation2 + $0x8] sm:$0x1] %v2038_v3  ;;  %2177 = vst [vmem:[#allocation2 + $0xa] sm:$0x1] %v2079_v33  ;;  %v2042_v10 = vpop.f32.mrb[23].mxu1  ;;  %v2083_v12 = vpop.f32.mrb[35].mxu0 }
 0x32c   : > { %2176 = vst [vmem:[#allocation2 + $0x9] sm:$0x1] %v2040_v5  ;;  %2178 = vst [vmem:[#allocation2 + $0xb] sm:$0x1] %v2081_v6  ;;  %v3568_v3 = vld [vmem:[%s4612_s12 + $0x8] ss:$24 sps:$4 sm:$0xff]  }
 0x32d   : > { %v3579_v5 = vld [vmem:[%s4612_s12 + $0x64] ss:$24 sps:$4 sm:$0xff]   ;;  %v3577_v6 = vld [vmem:[%s4612_s12 + $0x60] ss:$24 sps:$4 sm:$0xff]   ;;  %v3585_v10 = vld [vmem:[%s4612_s12 + $0x94] ss:$24 sps:$4 sm:$0xff]  }
 0x32e   : > { %v3582_v7 = vld [vmem:[%s4612_s12 + $0x6c] ss:$24 sps:$4 sm:$0xff]   ;;  %v3580_v8 = vld [vmem:[%s4612_s12 + $0x68] ss:$24 sps:$4 sm:$0xff]  }
 0x32f   : > { %v3583_v12 = vld [vmem:[%s4612_s12 + $0x90] ss:$24 sps:$4 sm:$0xff]  }
 0x348   : > { %v2119_v23 = vpop.f32.mrb[24].mxu1  ;;  %v2160_v24 = vpop.f32.mrb[36].mxu0 }
 0x349   : > { %v2120_v25 = vadd.f32 %v2119_v23, %v1810_v16  ;;  %v2161_v26 = vadd.f32 %v2160_v24, %v1818_v31  ;;  %v2121_v27 = vpop.f32.mrb[25].mxu1  ;;  %v2162_v28 = vpop.f32.mrb[37].mxu0  ;;  %v3588_v16 = vld [vmem:[%s4612_s12 + $0x9c] ss:$24 sps:$4 sm:$0xff]   ;;  %v3586_v31 = vld [vmem:[%s4612_s12 + $0x98] ss:$24 sps:$4 sm:$0xff]  }
 0x34a   : > { %v2122_v29 = vadd.f32 %v2121_v27, %v1814_v21  ;;  %v2163_v34 = vadd.f32 %v2162_v28, %v1822_v22  ;;  %v2123_v35 = vpop.f32.mrb[26].mxu1  ;;  %v2164_v36 = vpop.f32.mrb[38].mxu0  ;;  %v3591_v21 = vld [vmem:[%s4612_s12 + $0xc4] ss:$24 sps:$4 sm:$0xff]   ;;  %v3589_v22 = vld [vmem:[%s4612_s12 + $0xc0] ss:$24 sps:$4 sm:$0xff]  }
 0x34b   : > { %2179 = vst [vmem:[#allocation2 + $0xc] sm:$0x1] %v2120_v25  ;;  %2181 = vst [vmem:[#allocation2 + $0xe] sm:$0x1] %v2161_v26  ;;  %v2124_v38 = vpop.f32.mrb[27].mxu1  ;;  %v2165_v40 = vpop.f32.mrb[39].mxu0 }
 0x34c   : > { %2180 = vst [vmem:[#allocation2 + $0xd] sm:$0x1] %v2122_v29  ;;  %2182 = vst [vmem:[#allocation2 + $0xf] sm:$0x1] %v2163_v34  ;;  %v3594_v23 = vld [vmem:[%s4612_s12 + $0xcc] ss:$24 sps:$4 sm:$0xff]  }
 0x34d   : > { %v3592_v24 = vld [vmem:[%s4612_s12 + $0xc8] ss:$24 sps:$4 sm:$0xff]   ;;  %v3597_v25 = vld [vmem:[%s4612_s12 + $0xf4] ss:$24 sps:$4 sm:$0xff]   ;;  %v3598_v28 = vld [vmem:[%s4612_s12 + $0xf8] ss:$24 sps:$4 sm:$0xff]  }
 0x34e   : > { %v3595_v26 = vld [vmem:[%s4612_s12 + $0xf0] ss:$24 sps:$4 sm:$0xff]   ;;  %v3600_v27 = vld [vmem:[%s4612_s12 + $0xfc] ss:$24 sps:$4 sm:$0xff]   ;;  %v3601_v34 = vld [vmem:[%s4612_s12 + $0x120] ss:$24 sps:$4 sm:$0xff]  }
 0x34f   : > { %v3603_v29 = vld [vmem:[%s4612_s12 + $0x124] ss:$24 sps:$4 sm:$0xff]   ;;  %v3604_v35 = vld [vmem:[%s4612_s12 + $0x128] ss:$24 sps:$4 sm:$0xff]   ;;  %v3609_v38 = vld [vmem:[%s4612_s12 + $0x154] ss:$24 sps:$4 sm:$0xff]  }
 0x350   : > { %v3606_v36 = vld [vmem:[%s4612_s12 + $0x12c] ss:$24 sps:$4 sm:$0xff]   ;;  %v3607_v40 = vld [vmem:[%s4612_s12 + $0x150] ss:$24 sps:$4 sm:$0xff]  }
 0x353   : > { %v4411_v43 = vld [vmem:[#allocation2 + $0x8] sm:$0xff] }
 0x354   : > { %v2290_v45 = vpack.c.bf16 %v4411_v43, %v4409_v41 }
 0x356   : > { %3481 = vmatmul.mubr.bf16.vlgmr.msra.gmra.mrb[40].mxu0 %v2290_v45  ;;  %v3612_v45 = vld [vmem:[%s4612_s12 + $0x15c] ss:$24 sps:$4 sm:$0xff]  }
 0x357   : > { %2892 = vmatprep.mubr.bf16.mxu0 %v3659_v52  ;;  %2861 = vmatpush1.bf16.msra.mxu0 %v3565_v54 }
 0x358   : > { %2862 = vmatprep.subr.bf16.mxu0 %v3573_v19 }
 0x35b   : > { %2863 = vmatpush1.bf16.msra.mxu0 %v3571_v56 }
 0x35c   : > { %2864 = vmatprep.subr.bf16.mxu0 %v3579_v5  ;;  %v3636_v5 = vld [vmem:[%s4612_s12 + $0x164] ss:$24 sps:$4 sm:$0xff]  }
 0x35f   : > { %2865 = vmatpush1.bf16.msra.mxu0 %v3577_v6  ;;  %v3634_v6 = vld [vmem:[%s4612_s12 + $0x160] ss:$24 sps:$4 sm:$0xff]  }
 0x360   : > { %2866 = vmatprep.subr.bf16.mxu0 %v3585_v10 }
 0x363   : > { %2867 = vmatpush1.bf16.msra.mxu0 %v3583_v12 }
 0x364   : > { %2868 = vmatprep.subr.bf16.mxu0 %v3591_v21 }
 0x367   : > { %2869 = vmatpush1.bf16.msra.mxu0 %v3589_v22 }
 0x368   : > { %2870 = vmatprep.subr.bf16.mxu0 %v3597_v25 }
 0x369   : > { %v2284_v47 = vpop.f32.mrb[28].mxu1 }
 0x36a   : > { %v3462_v48 = vpop.f32.mrb[29].mxu1  ;;  %v2310_v9 = vrot.slane %v2284_v47, %v4366_v17  ;;  %v3610_v47 = vld [vmem:[%s4612_s12 + $0x158] ss:$24 sps:$4 sm:$0xff]  }
 0x36b   : > { %v2287_v49 = vpop.f32.mrb[30].mxu1  ;;  %2871 = vmatpush1.bf16.msra.mxu0 %v3595_v26  ;;  %v3615_v48 = vld [vmem:[%s4612_s12 + $0x14] ss:$24 sps:$4 sm:$0xff]  }
 0x36c   : > { %v3463_v13 = vpop.f32.mrb[31].mxu1  ;;  %2872 = vmatprep.subr.bf16.mxu0 %v3603_v29  ;;  %v3292_v49 = vld [vmem:[%s4611_s11] ss:$0 sm:$0xff] }
 0x36f   : > { %2873 = vmatpush1.bf16.msra.mxu0 %v3601_v34 }
 0x370   : > { %2874 = vmatprep.subr.bf16.mxu0 %v3609_v38 }
 0x373   : > { %2875 = vmatpush1.bf16.msra.mxu0 %v3607_v40 }
 0x374   : > { %2942 = vmatprep.subr.bf16.mxu0 %v3615_v48 }
 0x429   : > { %v2393_v57 = vpop.f32.mrb[40].mxu0 }
 0x42a   : > { %v2394_v58 = vadd.f32 %v2393_v57, %v2310_v9  ;;  %v3482_v59 = vpop.f32.mrb[41].mxu0 }
 0x42b   : > { %v2396_v37 = vpop.f32.mrb[42].mxu0 }
 0x42c   : > { %v2407_v61 = vadd.f32 %v3291_v15, %v2394_v58  ;;  %v2397_v60 = vadd.f32 %v2396_v37, %v2310_v9  ;;  %v3483_v62 = vpop.f32.mrb[43].mxu0 }
 0x42e   : > { %v2411_v63 = vmul.f32 0.2, %v2407_v61  ;;  %v2408_v0 = vadd.f32 %v3291_v15, %v2397_v60  ;;  %vm2409_vm3 = vcmp.gt.f32.partialorder %v2407_v61, 0.0  ;;  %v3613_v60 = vld [vmem:[%s4612_s12 + $0x10] ss:$24 sps:$4 sm:$0xff]  }
 0x430   : > { %vm2410_vm4 = vcmp.gt.f32.partialorder %v2408_v0, 0.0  ;;  %v2412_v1 = vmul.f32 0.2, %v2408_v0  ;;  %v2413_v2 = vsel %vm2409_vm3, %v2407_v61, %v2411_v63  ;;  %v3618_v63 = vld [vmem:[%s4612_s12 + $0x44] ss:$24 sps:$4 sm:$0xff]  }
 0x432   : > { %v2414_v42 = vsel %vm2410_vm4, %v2408_v0, %v2412_v1  ;;  %v3619_v0 = vld [vmem:[%s4612_s12 + $0x70] ss:$24 sps:$4 sm:$0xff]   ;;  %v3624_v1 = vld [vmem:[%s4612_s12 + $0xa4] ss:$24 sps:$4 sm:$0xff]  }
 0x433   : > { %v2415_v33 = vpack.c.bf16 %v2414_v42, %v2413_v2  ;;  %v3627_v2 = vld [vmem:[%s4612_s12 + $0xd4] ss:$24 sps:$4 sm:$0xff]   ;;  %v3625_v42 = vld [vmem:[%s4612_s12 + $0xd0] ss:$24 sps:$4 sm:$0xff]  }
 0x435   : > { %3501 = vmatmul.mubr.bf16.vlgmr.msra.gmra.mrb[32].mxu1 %v2415_v33  ;;  %v3628_v33 = vld [vmem:[%s4612_s12 + $0x100] ss:$24 sps:$4 sm:$0xff]  }
 0x436   : > { %2902 = vmatpush1.bf16.msra.mxu1 %v3568_v3  ;;  %2933 = vmatprep.mubr.bf16.mxu1 %v3659_v52  ;;  %v3630_v3 = vld [vmem:[%s4612_s12 + $0x104] ss:$24 sps:$4 sm:$0xff]  }
 0x437   : > { %2903 = vmatprep.subr.bf16.mxu1 %v3576_v39  ;;  %v3633_v39 = vld [vmem:[%s4612_s12 + $0x134] ss:$24 sps:$4 sm:$0xff]  }
 0x43a   : > { %2904 = vmatpush1.bf16.msra.mxu1 %v3574_v4  ;;  %v3631_v4 = vld [vmem:[%s4612_s12 + $0x130] ss:$24 sps:$4 sm:$0xff]  }
 0x43b   : > { %2905 = vmatprep.subr.bf16.mxu1 %v3582_v7  ;;  %v2588_v7 = vld [vmem:[%s4613_s13] sm:$0x3f] }
 0x43c   : > { %v2841_v10 = vrot.slane %v2588_v7, %v4369_v30  ;;  %v2837_v12 = vrot.slane %v2588_v7, %v4376_v32 }
 0x43e   : > { %2906 = vmatpush1.bf16.msra.mxu1 %v3580_v8  ;;  %v2833_v8 = vrot.slane %v2588_v7, %v4366_v17  ;;  %v3660_v17 = vmov 1966171168  }
 0x43f   : > { %2907 = vmatprep.subr.bf16.mxu1 %v3588_v16  ;;  %v2845_v16 = vrot.slane %v2588_v7, %v4379_v20  ;;  %v2999_v30 = vunpack.c.l.s4 %v3660_v17 }
 0x441   : > { %v3000_v32 = vunpack.c.0.s8 %v2999_v30 }
 0x442   : > { %2908 = vmatpush1.bf16.msra.mxu1 %v3586_v31 }
 0x443   : > { %2909 = vmatprep.subr.bf16.mxu1 %v3594_v23  ;;  %v3003_v38 = vsub.s32 %v3000_v32, %v4359_v14 }
 0x446   : > { %2910 = vmatpush1.bf16.msra.mxu1 %v3592_v24 }
 0x447   : > { %2911 = vmatprep.subr.bf16.mxu1 %v3600_v27 }
 0x44a   : > { %2912 = vmatpush1.bf16.msra.mxu1 %v3598_v28 }
 0x44b   : > { %2913 = vmatprep.subr.bf16.mxu1 %v3606_v36 }
 0x44e   : > { %2914 = vmatpush1.bf16.msra.mxu1 %v3604_v35 }
 0x44f   : > { %2915 = vmatprep.subr.bf16.mxu1 %v3612_v45 }
 0x452   : > { %2916 = vmatpush1.bf16.msra.mxu1 %v3610_v47 }
 0x508   : > { %v2521_v50 = vpop.f32.mrb[32].mxu1 }
 0x509   : > { %v2522_v13 = vadd.f32 %v3292_v49, %v2521_v50  ;;  %v3502_v51 = vpop.f32.mrb[33].mxu1 }
 0x50a   : > { %v2524_v53 = vpop.f32.mrb[34].mxu1  ;;  %v2849_v51 = vrot.slane %v2588_v7, %v4387_v44 }
 0x50b   : > { %v2525_v54 = vadd.f32 %v3292_v49, %v2524_v53  ;;  %v3503_v55 = vpop.f32.mrb[35].mxu1  ;;  %v2528_v18 = vadd.f32 %v2522_v13, %v4409_v41  ;;  %v3616_v41 = vld [vmem:[%s4612_s12 + $0x40] ss:$24 sps:$4 sm:$0xff]   ;;  %v2853_v53 = vrot.slane %v2588_v7, %v4391_v46 }
 0x50d   : > { %v2529_v19 = vadd.f32 %v2525_v54, %v4411_v43  ;;  %v3621_v43 = vld [vmem:[%s4612_s12 + $0x74] ss:$24 sps:$4 sm:$0xff]  }
 0x50f   : > { %v2530_v56 = vadd.f32 %v2529_v19, %v2528_v18 }
 0x511   : > { %v2531_v9 = vrot.slane %v2530_v56, 4 }
 0x513   : > { %v2532_v57 = vadd.f32 %v2531_v9, %v2530_v56 }
 0x515   : > { %v2533_v15 = vrot.slane %v2532_v57, 2 }
 0x517   : > { %v2534_v58 = vadd.f32 %v2533_v15, %v2532_v57 }
 0x519   : > { %v2535_v59 = vrot.slane %v2534_v58, 1 }
 0x51b   : > { %v2536_v37 = vadd.f32 %v2535_v59, %v2534_v58 }
 0x51d   : > { %v2538_v61 = vmul.f32 0.0625, %v2536_v37 }
 0x51f   : > { %v2539_v62 = vpack.c.bf16 %v2538_v61, %v2538_v61 }
 0x521   : > { %2893 = vmatmul.mubr.bf16.vlgmr.msra.gmra.mrb[44].mxu0 %v2539_v62  ;;  %2934 = vmatmul.mubr.bf16.vlgmr.msra.gmra.mrb[36].mxu1 %v2539_v62 }
 0x522   : > { %2943 = vmatpush1.bf16.msra.mxu0 %v3613_v60  ;;  %2974 = vmatprep.mubr.bf16.mxu0 %v3659_v52  ;;  %v3622_v52 = vld [vmem:[%s4612_s12 + $0xa0] ss:$24 sps:$4 sm:$0xff]  }
 0x523   : > { %2944 = vmatprep.subr.bf16.mxu0 %v3618_v63 }
 0x526   : > { %2945 = vmatpush1.bf16.msra.mxu0 %v3616_v41 }
 0x527   : > { %2946 = vmatprep.subr.bf16.mxu0 %v3621_v43 }
 0x52a   : > { %2947 = vmatpush1.bf16.msra.mxu0 %v3619_v0 }
 0x52b   : > { %2948 = vmatprep.subr.bf16.mxu0 %v3624_v1 }
 0x52e   : > { %2949 = vmatpush1.bf16.msra.mxu0 %v3622_v52 }
 0x52f   : > { %2950 = vmatprep.subr.bf16.mxu0 %v3627_v2 }
 0x532   : > { %2951 = vmatpush1.bf16.msra.mxu0 %v3625_v42 }
 0x533   : > { %2952 = vmatprep.subr.bf16.mxu0 %v3630_v3 }
 0x536   : > { %2953 = vmatpush1.bf16.msra.mxu0 %v3628_v33 }
 0x537   : > { %2954 = vmatprep.subr.bf16.mxu0 %v3633_v39 }
 0x53a   : > { %2955 = vmatpush1.bf16.msra.mxu0 %v3631_v4 }
 0x53b   : > { %2956 = vmatprep.subr.bf16.mxu0 %v3636_v5 }
 0x53e   : > { %2957 = vmatpush1.bf16.msra.mxu0 %v3634_v6 }
 0x541   : > { %2975 = vmatmul.mubr.bf16.vlgmr.msra.gmra.mrb[48].mxu0 %v2539_v62 }
 0x5f4   : > { %v2894_v31 = vpop.f32.mrb[44].mxu0  ;;  %v2935_v21 = vpop.f32.mrb[36].mxu1 }
 0x5f5   : > { %v2895_v22 = vadd.f32 %v2894_v31, %v2833_v8  ;;  %v2936_v23 = vadd.f32 %v2935_v21, %v2841_v10  ;;  %v2896_v24 = vpop.f32.mrb[45].mxu0  ;;  %v2937_v25 = vpop.f32.mrb[37].mxu1 }
 0x5f6   : > { %v2897_v26 = vadd.f32 %v2896_v24, %v2837_v12  ;;  %v2938_v27 = vadd.f32 %v2937_v25, %v2845_v16  ;;  %v2898_v28 = vpop.f32.mrb[46].mxu0  ;;  %v2939_v29 = vpop.f32.mrb[38].mxu1 }
 0x5f7   : > { %3637 = vtanh.f32 %v2895_v22  ;;  %v2899_v34 = vpop.f32.mrb[47].mxu0  ;;  %v2940_v35 = vpop.f32.mrb[39].mxu1 }
 0x5f8   : > { %3639 = vtanh.f32 %v2936_v23 }
 0x5f9   : > { %3641 = vtanh.f32 %v2897_v26 }
 0x5fa   : > { %3643 = vtanh.f32 %v2938_v27 }
 0x601   : > { %v3638_v20 = vpop.eup %3637 }
 0x602   : > { %v3640_v36 = vpop.eup %3639 }
 0x603   : > { %v3642_v40 = vpop.eup %3641 }
 0x604   : > { %v3644_v45 = vpop.eup %3643  ;;  %v2995_v47 = vcombine.low %v3638_v20, %v3642_v40 }
 0x605   : > { %v2996_v48 = vcombine.low %v3640_v36, %v3644_v45 }
 0x606   : > { %v3004_v49 = vrot.slane %v2995_v47, %v3003_v38 }
 0x607   : > { %v3011_v50 = vrot.slane %v2996_v48, %v3003_v38 }
 0x609   : > { %v3019_v13 = vcombine.low %v3004_v49, %v3011_v50 }
 0x60b   : > { %v3026_v59 = vrot.slane %v3019_v13, %v3003_v38 }
 0x614   : > { %v2976_v54 = vpop.f32.mrb[48].mxu0 }
 0x615   : > { %v2977_v55 = vadd.f32 %v2976_v54, %v2849_v51  ;;  %v2978_v18 = vpop.f32.mrb[49].mxu0 }
 0x616   : > { %v2979_v19 = vadd.f32 %v2978_v18, %v2853_v53  ;;  %v2980_v56 = vpop.f32.mrb[50].mxu0 }
 0x617   : > { %3645 = vtanh.f32 %v2977_v55  ;;  %v2981_v9 = vpop.f32.mrb[51].mxu0 }
 0x618   : > { %3647 = vtanh.f32 %v2979_v19 }
 0x621   : > { %v3646_v14 = vpop.eup %3645 }
 0x622   : > { %v3648_v57 = vpop.eup %3647 }
 0x623   : > { %v2997_v15 = vcombine.low %v3646_v14, %v3648_v57 }
 0x625   : > { %v3018_v58 = vrot.slane %v2997_v15, %v3003_v38 }
 0x627   : > { %v3033_v37 = vrot.slane %v3018_v58, %v3003_v38 }
 0x629   : > { %v3034_v44 = vcombine.low %v3026_v59, %v3033_v37 }
 0x62b   : > { %3040 = vst.msk [vmem:[%s479_s25] sm:$0x3f] %vm3038_vm5, %v3034_v44 }
 0x62c PF: > { %s24_s29 = sadd.s32 1, %s3655_s29  }
 0x62d   : > { %p21_p4 = scmp.ge.s32.totalorder %s24_s29, 4  }
 0x62f   :  { %23 = sbr.rel (!%p21_p4) target bundleno = 1 (0x1), region = 109 }

</bundles_post_ra>
